<compile_context>
chip_gen: v7x
topology: tpu7x:2x2x1
jax: 0.10.0
libtpu: 0.0.40
codegen_flags: <defaults>
</compile_context>

<pallas_src>
import numpy as np
import jax
import jax.numpy as jnp
from jax.experimental import pallas as pl
from jax.experimental.pallas import tpu as pltpu


# ----------------------------------------------------------------------------
# The fused per-batch kernel (grid = (B,), one batch element per grid step)
# ----------------------------------------------------------------------------
def _fused_unet_dnn_kernel(
        x_ref,                                   # (1, H, W*Cin)            f32
        m1_ref, b1_ref,                          # (3, W*Cin, W*C1) bf16, (1, W*C1) f32
        selwe_ref, selwo_ref,                    # (W*C1, Wh*C1)    bf16
        m2_ref, b2_ref,                          # (3, Wh*C1, Wh*C2) bf16, (1, Wh*C2) f32
        rowdup_ref,                              # (H, Hh)          bf16
        m3u_ref, m3s_ref, b3_ref,                # (3, Wh*C2, W*C4) / (3, W*C1, W*C4) bf16, (1, W*C4) f32
        weff_ref, beff_ref,                      # (H*W*C4, N1) bf16, (1, N1) f32
        wfc2_ref, bfc2_ref,                      # (N1, N2) bf16, (1, N2) f32
        o_ref,                                   # (1, 1, N2) f32
        xpad, e1pad, p1pad, uppad):              # VMEM padded-slab scratch
    f32, bf16 = jnp.float32, jnp.bfloat16
    H, WCin = x_ref.shape[1], x_ref.shape[2]
    WC1 = b1_ref.shape[-1]
    WhC1 = selwe_ref.shape[-1]
    WhC2 = b2_ref.shape[-1]
    WC4 = b3_ref.shape[-1]
    Hh = H // 2

    def dot(a, w):
        return jnp.dot(a.astype(bf16), w, preferred_element_type=f32)

    # Zero only the 2-row H halo of each padded slab (interiors are fully
    # overwritten below; W padding is already baked into the banded weights).
    xpad[0:1, :] = jnp.zeros((1, WCin), f32)
    xpad[H + 1:H + 2, :] = jnp.zeros((1, WCin), f32)
    e1pad[0:1, :] = jnp.zeros((1, WC1), f32)
    e1pad[H + 1:H + 2, :] = jnp.zeros((1, WC1), f32)
    p1pad[0:1, :] = jnp.zeros((1, WhC1), f32)
    p1pad[Hh + 1:Hh + 2, :] = jnp.zeros((1, WhC1), f32)
    uppad[0:1, :] = jnp.zeros((1, WhC2), f32)
    uppad[H + 1:H + 2, :] = jnp.zeros((1, WhC2), f32)

    # ---- encoder conv1: 3x3 / pad 1 / ReLU  (3 row-shifted banded matmuls) ----
    xpad[1:H + 1, :] = x_ref[0]
    e1 = (dot(xpad[0:H, :],     m1_ref[0]) +
          dot(xpad[1:H + 1, :], m1_ref[1]) +
          dot(xpad[2:H + 2, :], m1_ref[2]) + b1_ref[...])
    e1 = jnp.maximum(e1, 0.0)                                     # (H, W*C1)
    e1pad[1:H + 1, :] = e1                                        # skip connection

    # ---- 2x2 max-pool: stride-2 row reads + two tiny lane-select matmuls ----
    hmax = jnp.maximum(e1pad[pl.ds(1, Hh, stride=2), :],
                       e1pad[pl.ds(2, Hh, stride=2), :])          # (Hh, W*C1)
    p1 = jnp.maximum(dot(hmax, selwe_ref[...]),
                     dot(hmax, selwo_ref[...]))                   # (Hh, Wh*C1)
    p1pad[1:Hh + 1, :] = p1

    # ---- encoder conv2: 3x3 / pad 1 / ReLU at half resolution ----
    e2 = (dot(p1pad[0:Hh, :],      m2_ref[0]) +
          dot(p1pad[1:Hh + 1, :],  m2_ref[1]) +
          dot(p1pad[2:Hh + 2, :],  m2_ref[2]) + b2_ref[...])
    e2 = jnp.maximum(e2, 0.0)                                     # (Hh, Wh*C2)

    # ---- nearest 2x upsample: H row-duplication (tiny matmul); the W
    #      duplication and the channel concat are folded into m3u / m3s ----
    up = jnp.dot(rowdup_ref[...], e2.astype(bf16),
                 preferred_element_type=f32)                      # (H, Wh*C2)
    uppad[1:H + 1, :] = up

    # ---- decoder conv3: 3x3 / pad 1 / ReLU (upsample + concat folded in) ----
    d1 = (dot(uppad[0:H, :],     m3u_ref[0]) +
          dot(uppad[1:H + 1, :], m3u_ref[1]) +
          dot(uppad[2:H + 2, :], m3u_ref[2]) +
          dot(e1pad[0:H, :],     m3s_ref[0]) +
          dot(e1pad[1:H + 1, :], m3s_ref[1]) +
          dot(e1pad[2:H + 2, :], m3s_ref[2]) + b3_ref[...])
    d1 = jnp.maximum(d1, 0.0)                                     # (H, W*C4)

    # ---- fused [1x1 conv -> drop last ch -> NCHW flatten -> fc1]+ReLU, fc2 ----
    flat = d1.reshape(1, H * WC4)                                 # (1, H*W*C4)
    h1 = jnp.dot(flat.astype(bf16), weff_ref[...],
                 preferred_element_type=f32) + beff_ref[...]
    h1 = jnp.maximum(h1, 0.0)                                     # (1, N1)
    o_ref[0] = (jnp.dot(h1.astype(bf16), wfc2_ref[...],
                        preferred_element_type=f32) + bfc2_ref[...])


# ----------------------------------------------------------------------------
# Wrapper
# ----------------------------------------------------------------------------
def _const_spec(arr):
    nd = arr.ndim
    return pl.BlockSpec(arr.shape, lambda b, _nd=nd: (0,) * _nd)


def unet_dnn_forward(x_nchw, kp):
    """Fused UNet_DNN forward. x_nchw: (B, 4, 16, 16) float32 (PyTorch NCHW)."""
    B, Cin, H, W = x_nchw.shape
    Hh = H // 2
    # Lane-dense row slabs: lane index = w*Cin + ci (channels fastest per W group).
    x_slab = jnp.transpose(x_nchw, (0, 2, 3, 1)).reshape(B, H, W * Cin)

    WC1 = kp["b1row"].shape[-1]
    WhC1 = kp["selwe"].shape[-1]
    WhC2 = kp["b2row"].shape[-1]
    N2 = kp["bfc2"].shape[-1]

    weights = (kp["m1"], kp["b1row"], kp["selwe"], kp["selwo"],
               kp["m2"], kp["b2row"], kp["rowdup"],
               kp["m3u"], kp["m3s"], kp["b3row"],
               kp["weff"], kp["beff"], kp["wfc2"], kp["bfc2"])

    out = pl.pallas_call(
        _fused_unet_dnn_kernel,
        out_shape=jax.ShapeDtypeStruct((B, 1, N2), jnp.float32),
        grid=(B,),
        in_specs=[pl.BlockSpec((1, H, W * Cin), lambda b: (b, 0, 0))]
                 + [_const_spec(w) for w in weights],
        out_specs=pl.BlockSpec((1, 1, N2), lambda b: (b, 0, 0)),
        scratch_shapes=[
            pltpu.VMEM((H + 2, W * Cin), jnp.float32),    # xpad
            pltpu.VMEM((H + 2, WC1), jnp.float32),        # e1pad (skip)
            pltpu.VMEM((Hh + 2, WhC1), jnp.float32),      # p1pad
            pltpu.VMEM((H + 2, WhC2), jnp.float32),       # uppad
        ],
        compiler_params=pltpu.CompilerParams(
            dimension_semantics=("parallel",)),            # v7x: use both TCs
    )(x_slab, *weights)
    return out[:, 0, :]


# ----------------------------------------------------------------------------
# Parameters (deterministic synthetic init, PyTorch-style layout) + kernel prep
# ----------------------------------------------------------------------------
def init_params(key):
    ks = jax.random.split(key, 6)

    def conv_w(k, kh, kw, cin, cout):
        scale = 1.0 / jnp.sqrt(kh * kw * cin)
        return scale * jax.random.normal(k, (kh, kw, cin, cout), jnp.float32)

    def lin_w(k, fin, fout):
        scale = 1.0 / jnp.sqrt(fin)
        return scale * jax.random.normal(k, (fin, fout), jnp.float32)

    return {
        "enc1_w": conv_w(ks[0], 3, 3, 4, 8),   "enc1_b": jnp.zeros((1, 8), jnp.float32),
        "enc2_w": conv_w(ks[1], 3, 3, 8, 16),  "enc2_b": jnp.zeros((1, 16), jnp.float32),
        "dec_w":  conv_w(ks[2], 3, 3, 24, 8),  "dec_b":  jnp.zeros((1, 8), jnp.float32),
        "out_w":  conv_w(ks[3], 1, 1, 8, 5),   "out_b":  jnp.zeros((1, 5), jnp.float32),
        "fc1_w":  lin_w(ks[4], 4 * 16 * 16, 32), "fc1_b": jnp.zeros((1, 32), jnp.float32),
        "fc2_w":  lin_w(ks[5], 32, 8),           "fc2_b": jnp.zeros((1, 8), jnp.float32),
    }


def _banded3x3(kern_hwio, w_sp):
    """3x3 conv (pad=1, W padding baked in): (3, w_sp*Cin, w_sp*Cout) so that
    out_row(h) = sum_dh padded_in_slab[h+dh] @ M[dh]."""
    k = np.asarray(kern_hwio, np.float32)
    cin, cout = k.shape[2], k.shape[3]
    m = np.zeros((3, w_sp * cin, w_sp * cout), np.float32)
    for dh in range(3):
        for w_out in range(w_sp):
            for dw in range(3):
                w_in = w_out + dw - 1
                if 0 <= w_in < w_sp:
                    m[dh, w_in * cin:(w_in + 1) * cin,
                          w_out * cout:(w_out + 1) * cout] = k[dh, dw]
    return m


def _banded3x3_upsampled(kern_hwio, w_full):
    """Like _banded3x3 but the input row is half-W resolution and is nearest-
    upsampled x2 along W before the conv (upsample folded into the weight)."""
    k = np.asarray(kern_hwio, np.float32)
    cin, cout = k.shape[2], k.shape[3]
    m = np.zeros((3, (w_full // 2) * cin, w_full * cout), np.float32)
    for dh in range(3):
        for w_out in range(w_full):
            for dw in range(3):
                w_in = w_out + dw - 1
                if 0 <= w_in < w_full:
                    wh = w_in // 2
                    m[dh, wh * cin:(wh + 1) * cin,
                          w_out * cout:(w_out + 1) * cout] += k[dh, dw]
    return m


def _pool_w_select(w_sp, c):
    """Even/odd 0/1 lane-select mats (w_sp*c, (w_sp//2)*c): lane (2j+p)*c+ch -> j*c+ch."""
    wh = w_sp // 2
    even = np.zeros((w_sp * c, wh * c), np.float32)
    odd = np.zeros((w_sp * c, wh * c), np.float32)
    for j in range(wh):
        for ch in range(c):
            even[(2 * j) * c + ch, j * c + ch] = 1.0
            odd[(2 * j + 1) * c + ch, j * c + ch] = 1.0
    return even, odd


def prepare_params(p, H=16, W=16):
    """One-time weight prep: banded row-matmul conv weights (W taps, padding,
    nearest-upsample and skip concat folded in), pool selection matrices, and
    the fusion of [1x1 conv (8->5) -> drop last channel -> NCHW flatten -> fc1]."""
    bf16, f32 = jnp.bfloat16, jnp.float32
    Hh, Wh = H // 2, W // 2

    e1w = np.asarray(p["enc1_w"]); C1 = e1w.shape[-1]
    e2w = np.asarray(p["enc2_w"]); C2 = e2w.shape[-1]
    dcw = np.asarray(p["dec_w"]);  C4 = dcw.shape[-1]

    m1 = _banded3x3(e1w, W)                              # (3, W*Cin, W*C1)
    m2 = _banded3x3(e2w, Wh)                             # (3, Wh*C1, Wh*C2)
    # decoder input channels: [0:C2] = upsampled e2, [C2:C2+C1] = e1 skip
    m3u = _banded3x3_upsampled(dcw[:, :, :C2, :], W)     # (3, Wh*C2, W*C4)
    m3s = _banded3x3(dcw[:, :, C2:, :], W)               # (3, W*C1, W*C4)

    selwe, selwo = _pool_w_select(W, C1)                 # (W*C1, Wh*C1)
    rowdup = np.zeros((H, Hh), np.float32)
    rowdup[np.arange(H), np.arange(H) // 2] = 1.0        # up row h <- e2 row h//2

    # fuse [1x1 conv -> drop last channel -> NCHW flatten -> fc1]
    ow = np.asarray(p["out_w"]).reshape(C4, -1)[:, :-1]              # (C4, 4)
    ob = np.asarray(p["out_b"]).reshape(-1)[:-1]                     # (4,)
    n1 = p["fc1_w"].shape[1]
    fc1w = np.asarray(p["fc1_w"]).reshape(ow.shape[1], H, W, n1)     # (c, h, w, n)
    weff = np.einsum("kc,chwn->hwkn", ow, fc1w).reshape(H * W * C4, n1)
    beff = np.asarray(p["fc1_b"]) + np.einsum("c,chwn->n", ob, fc1w)[None, :]

    def tile_bias(b, reps):          # lane order is w-major, channel-fastest
        return np.tile(np.asarray(b).reshape(-1), reps)[None, :]

    return {
        "m1": jnp.asarray(m1, bf16), "b1row": jnp.asarray(tile_bias(p["enc1_b"], W), f32),
        "selwe": jnp.asarray(selwe, bf16), "selwo": jnp.asarray(selwo, bf16),
        "m2": jnp.asarray(m2, bf16), "b2row": jnp.asarray(tile_bias(p["enc2_b"], Wh), f32),
        "rowdup": jnp.asarray(rowdup, bf16),
        "m3u": jnp.asarray(m3u, bf16), "m3s": jnp.asarray(m3s, bf16),
        "b3row": jnp.asarray(tile_bias(p["dec_b"], W), f32),
        "weff": jnp.asarray(weff, bf16), "beff": jnp.asarray(beff, f32),
        "wfc2": jnp.asarray(p["fc2_w"], bf16), "bfc2": jnp.asarray(p["fc2_b"], f32),
    }


# ----------------------------------------------------------------------------
if __name__ == "__main__":
    key = jax.random.PRNGKey(0)
    k_param, k_x = jax.random.split(key)

    params = init_params(k_param)
    x = jax.random.normal(k_x, (2, 4, 16, 16), jnp.float32)   # NCHW, like PyTorch

    kparams = prepare_params(params, H=x.shape[2], W=x.shape[3])
    fwd = jax.jit(unet_dnn_forward)
    out = fwd(x, kparams)
    jax.block_until_ready(out)

    assert out.shape == (2, 8) and out.dtype == jnp.float32
    assert bool(jnp.all(jnp.isfinite(out)))
    print("KERNEL_OK")
</pallas_src>

<mosaic_0001>
module attributes {stable_mosaic.version = 11 : i64} {
  func.func @_fused_unet_dnn_kernel(%arg0: i32, %arg1: memref<1x16x64xf32, #tpu.memory_space<vmem>>, %arg2: memref<3x64x128xbf16, #tpu.memory_space<vmem>>, %arg3: memref<1x128xf32, #tpu.memory_space<vmem>>, %arg4: memref<128x64xbf16, #tpu.memory_space<vmem>>, %arg5: memref<128x64xbf16, #tpu.memory_space<vmem>>, %arg6: memref<3x64x128xbf16, #tpu.memory_space<vmem>>, %arg7: memref<1x128xf32, #tpu.memory_space<vmem>>, %arg8: memref<16x8xbf16, #tpu.memory_space<vmem>>, %arg9: memref<3x128x128xbf16, #tpu.memory_space<vmem>>, %arg10: memref<3x128x128xbf16, #tpu.memory_space<vmem>>, %arg11: memref<1x128xf32, #tpu.memory_space<vmem>>, %arg12: memref<2048x32xbf16, #tpu.memory_space<vmem>>, %arg13: memref<1x32xf32, #tpu.memory_space<vmem>>, %arg14: memref<32x8xbf16, #tpu.memory_space<vmem>>, %arg15: memref<1x8xf32, #tpu.memory_space<vmem>>, %arg16: memref<1x1x8xf32, #tpu.memory_space<vmem>>, %arg17: memref<18x64xf32, #tpu.memory_space<vmem>>, %arg18: memref<18x128xf32, #tpu.memory_space<vmem>>, %arg19: memref<10x64xf32, #tpu.memory_space<vmem>>, %arg20: memref<18x128xf32, #tpu.memory_space<vmem>>) attributes {dimension_semantics = [#tpu.dimension_semantics<parallel>], iteration_bounds = array<i64: 2>, scalar_prefetch = 0 : i64, scratch_operands = 4 : i64, tpu.core_type = #tpu.core_type<tc>, window_params = [{transform_indices = @transform_0, window_bounds = array<i64: 1, 16, 64>}, {pipeline_mode = #tpu.pipeline_mode<synchronous>, transform_indices = @transform_1, window_bounds = array<i64: 3, 64, 128>}, {pipeline_mode = #tpu.pipeline_mode<synchronous>, transform_indices = @transform_2, window_bounds = array<i64: 1, 128>}, {pipeline_mode = #tpu.pipeline_mode<synchronous>, transform_indices = @transform_3, window_bounds = array<i64: 128, 64>}, {pipeline_mode = #tpu.pipeline_mode<synchronous>, transform_indices = @transform_4, window_bounds = array<i64: 128, 64>}, {pipeline_mode = #tpu.pipeline_mode<synchronous>, transform_indices = @transform_5, window_bounds = array<i64: 3, 64, 128>}, {pipeline_mode = #tpu.pipeline_mode<synchronous>, transform_indices = @transform_6, window_bounds = array<i64: 1, 128>}, {pipeline_mode = #tpu.pipeline_mode<synchronous>, transform_indices = @transform_7, window_bounds = array<i64: 16, 8>}, {pipeline_mode = #tpu.pipeline_mode<synchronous>, transform_indices = @transform_8, window_bounds = array<i64: 3, 128, 128>}, {pipeline_mode = #tpu.pipeline_mode<synchronous>, transform_indices = @transform_9, window_bounds = array<i64: 3, 128, 128>}, {pipeline_mode = #tpu.pipeline_mode<synchronous>, transform_indices = @transform_10, window_bounds = array<i64: 1, 128>}, {pipeline_mode = #tpu.pipeline_mode<synchronous>, transform_indices = @transform_11, window_bounds = array<i64: 2048, 32>}, {pipeline_mode = #tpu.pipeline_mode<synchronous>, transform_indices = @transform_12, window_bounds = array<i64: 1, 32>}, {pipeline_mode = #tpu.pipeline_mode<synchronous>, transform_indices = @transform_13, window_bounds = array<i64: 32, 8>}, {pipeline_mode = #tpu.pipeline_mode<synchronous>, transform_indices = @transform_14, window_bounds = array<i64: 1, 8>}, {transform_indices = @transform_15, window_bounds = array<i64: 1, 1, 8>}]} {
    %cst = arith.constant 0.000000e+00 : f32
    %0 = vector.broadcast %cst : f32 to vector<1x64xf32>
    %c0 = arith.constant 0 : index
    %c0_0 = arith.constant 0 : index
    %1 = vector.load %arg17[%c0, %c0_0] : memref<18x64xf32, #tpu.memory_space<vmem>>, vector<1x64xf32>
    tpu.vector_store %arg17[%c0, %c0_0], %0 {strides = array<i32>} : memref<18x64xf32, #tpu.memory_space<vmem>>, vector<1x64xf32>,
    %cst_1 = arith.constant 0.000000e+00 : f32
    %2 = vector.broadcast %cst_1 : f32 to vector<1x64xf32>
    %c17 = arith.constant 17 : index
    %c0_2 = arith.constant 0 : index
    %3 = vector.load %arg17[%c17, %c0_2] : memref<18x64xf32, #tpu.memory_space<vmem>>, vector<1x64xf32>
    tpu.vector_store %arg17[%c17, %c0_2], %2 {strides = array<i32>} : memref<18x64xf32, #tpu.memory_space<vmem>>, vector<1x64xf32>,
    %cst_3 = arith.constant 0.000000e+00 : f32
    %4 = vector.broadcast %cst_3 : f32 to vector<1x128xf32>
    %c0_4 = arith.constant 0 : index
    %c0_5 = arith.constant 0 : index
    %5 = vector.load %arg18[%c0_4, %c0_5] : memref<18x128xf32, #tpu.memory_space<vmem>>, vector<1x128xf32>
    tpu.vector_store %arg18[%c0_4, %c0_5], %4 {strides = array<i32>} : memref<18x128xf32, #tpu.memory_space<vmem>>, vector<1x128xf32>,
    %cst_6 = arith.constant 0.000000e+00 : f32
    %6 = vector.broadcast %cst_6 : f32 to vector<1x128xf32>
    %c17_7 = arith.constant 17 : index
    %c0_8 = arith.constant 0 : index
    %7 = vector.load %arg18[%c17_7, %c0_8] : memref<18x128xf32, #tpu.memory_space<vmem>>, vector<1x128xf32>
    tpu.vector_store %arg18[%c17_7, %c0_8], %6 {strides = array<i32>} : memref<18x128xf32, #tpu.memory_space<vmem>>, vector<1x128xf32>,
    %cst_9 = arith.constant 0.000000e+00 : f32
    %8 = vector.broadcast %cst_9 : f32 to vector<1x64xf32>
    %c0_10 = arith.constant 0 : index
    %c0_11 = arith.constant 0 : index
    %9 = vector.load %arg19[%c0_10, %c0_11] : memref<10x64xf32, #tpu.memory_space<vmem>>, vector<1x64xf32>
    tpu.vector_store %arg19[%c0_10, %c0_11], %8 {strides = array<i32>} : memref<10x64xf32, #tpu.memory_space<vmem>>, vector<1x64xf32>,
    %cst_12 = arith.constant 0.000000e+00 : f32
    %10 = vector.broadcast %cst_12 : f32 to vector<1x64xf32>
    %c9 = arith.constant 9 : index
    %c0_13 = arith.constant 0 : index
    %11 = vector.load %arg19[%c9, %c0_13] : memref<10x64xf32, #tpu.memory_space<vmem>>, vector<1x64xf32>
    tpu.vector_store %arg19[%c9, %c0_13], %10 {strides = array<i32>} : memref<10x64xf32, #tpu.memory_space<vmem>>, vector<1x64xf32>,
    %cst_14 = arith.constant 0.000000e+00 : f32
    %12 = vector.broadcast %cst_14 : f32 to vector<1x128xf32>
    %c0_15 = arith.constant 0 : index
    %c0_16 = arith.constant 0 : index
    %13 = vector.load %arg20[%c0_15, %c0_16] : memref<18x128xf32, #tpu.memory_space<vmem>>, vector<1x128xf32>
    tpu.vector_store %arg20[%c0_15, %c0_16], %12 {strides = array<i32>} : memref<18x128xf32, #tpu.memory_space<vmem>>, vector<1x128xf32>,
    %cst_17 = arith.constant 0.000000e+00 : f32
    %14 = vector.broadcast %cst_17 : f32 to vector<1x128xf32>
    %c17_18 = arith.constant 17 : index
    %c0_19 = arith.constant 0 : index
    %15 = vector.load %arg20[%c17_18, %c0_19] : memref<18x128xf32, #tpu.memory_space<vmem>>, vector<1x128xf32>
    tpu.vector_store %arg20[%c17_18, %c0_19], %14 {strides = array<i32>} : memref<18x128xf32, #tpu.memory_space<vmem>>, vector<1x128xf32>,
    %c0_20 = arith.constant 0 : index
    %c0_21 = arith.constant 0 : index
    %c0_22 = arith.constant 0 : index
    %16 = vector.load %arg1[%c0_20, %c0_21, %c0_22] : memref<1x16x64xf32, #tpu.memory_space<vmem>>, vector<1x16x64xf32>
    %17 = vector.shape_cast %16 : vector<1x16x64xf32> to vector<16x64xf32>
    %c1 = arith.constant 1 : index
    %c0_23 = arith.constant 0 : index
    %18 = vector.load %arg17[%c1, %c0_23] : memref<18x64xf32, #tpu.memory_space<vmem>>, vector<16x64xf32>
    tpu.vector_store %arg17[%c1, %c0_23], %17 {strides = array<i32>} : memref<18x64xf32, #tpu.memory_space<vmem>>, vector<16x64xf32>,
    %c0_24 = arith.constant 0 : index
    %c0_25 = arith.constant 0 : index
    %19 = vector.load %arg17[%c0_24, %c0_25] : memref<18x64xf32, #tpu.memory_space<vmem>>, vector<16x64xf32>
    %c0_26 = arith.constant 0 : index
    %c0_27 = arith.constant 0 : index
    %c0_28 = arith.constant 0 : index
    %20 = vector.load %arg2[%c0_26, %c0_27, %c0_28] : memref<3x64x128xbf16, #tpu.memory_space<vmem>>, vector<1x64x128xbf16>
    %21 = vector.shape_cast %20 : vector<1x64x128xbf16> to vector<64x128xbf16>
    %22 = arith.truncf %19 : vector<16x64xf32> to vector<16x64xbf16>
    %cst_29 = arith.constant dense<0.000000e+00> : vector<16x128xf32>
    %23 = tpu.matmul %22, %21, %cst_29 {dimension_numbers = #tpu.dot_dimension_numbers<[1], [0], [0], [1], [0, 0, 1, 1], [], []>} : vector<16x64xbf16>, vector<64x128xbf16>, vector<16x128xf32> -> vector<16x128xf32>
    %c1_30 = arith.constant 1 : index
    %c0_31 = arith.constant 0 : index
    %24 = vector.load %arg17[%c1_30, %c0_31] : memref<18x64xf32, #tpu.memory_space<vmem>>, vector<16x64xf32>
    %c1_32 = arith.constant 1 : index
    %c0_33 = arith.constant 0 : index
    %c0_34 = arith.constant 0 : index
    %25 = vector.load %arg2[%c1_32, %c0_33, %c0_34] : memref<3x64x128xbf16, #tpu.memory_space<vmem>>, vector<1x64x128xbf16>
    %26 = vector.shape_cast %25 : vector<1x64x128xbf16> to vector<64x128xbf16>
    %27 = arith.truncf %24 : vector<16x64xf32> to vector<16x64xbf16>
    %cst_35 = arith.constant dense<0.000000e+00> : vector<16x128xf32>
    %28 = tpu.matmul %27, %26, %cst_35 {dimension_numbers = #tpu.dot_dimension_numbers<[1], [0], [0], [1], [0, 0, 1, 1], [], []>} : vector<16x64xbf16>, vector<64x128xbf16>, vector<16x128xf32> -> vector<16x128xf32>
    %29 = arith.addf %23, %28 : vector<16x128xf32>
    %c2 = arith.constant 2 : index
    %c0_36 = arith.constant 0 : index
    %30 = vector.load %arg17[%c2, %c0_36] : memref<18x64xf32, #tpu.memory_space<vmem>>, vector<16x64xf32>
    %c2_37 = arith.constant 2 : index
    %c0_38 = arith.constant 0 : index
    %c0_39 = arith.constant 0 : index
    %31 = vector.load %arg2[%c2_37, %c0_38, %c0_39] : memref<3x64x128xbf16, #tpu.memory_space<vmem>>, vector<1x64x128xbf16>
    %32 = vector.shape_cast %31 : vector<1x64x128xbf16> to vector<64x128xbf16>
    %33 = arith.truncf %30 : vector<16x64xf32> to vector<16x64xbf16>
    %cst_40 = arith.constant dense<0.000000e+00> : vector<16x128xf32>
    %34 = tpu.matmul %33, %32, %cst_40 {dimension_numbers = #tpu.dot_dimension_numbers<[1], [0], [0], [1], [0, 0, 1, 1], [], []>} : vector<16x64xbf16>, vector<64x128xbf16>, vector<16x128xf32> -> vector<16x128xf32>
    %35 = arith.addf %29, %34 : vector<16x128xf32>
    %c0_41 = arith.constant 0 : index
    %c0_42 = arith.constant 0 : index
    %36 = vector.load %arg3[%c0_41, %c0_42] : memref<1x128xf32, #tpu.memory_space<vmem>>, vector<1x128xf32>
    %37 = vector.broadcast %36 : vector<1x128xf32> to vector<16x128xf32>
    %38 = arith.addf %35, %37 : vector<16x128xf32>
    %cst_43 = arith.constant 0.000000e+00 : f32
    %39 = vector.broadcast %cst_43 : f32 to vector<16x128xf32>
    %40 = arith.maximumf %38, %39 : vector<16x128xf32>
    %c1_44 = arith.constant 1 : index
    %c0_45 = arith.constant 0 : index
    %41 = vector.load %arg18[%c1_44, %c0_45] : memref<18x128xf32, #tpu.memory_space<vmem>>, vector<16x128xf32>
    tpu.vector_store %arg18[%c1_44, %c0_45], %40 {strides = array<i32>} : memref<18x128xf32, #tpu.memory_space<vmem>>, vector<16x128xf32>,
    %c1_46 = arith.constant 1 : index
    %c0_47 = arith.constant 0 : index
    %42 = tpu.strided_load %arg18[%c1_46, %c0_47] {strides = array<i32: 2, 1>} : memref<18x128xf32, #tpu.memory_space<vmem>>, vector<8x128xf32>
    %c2_48 = arith.constant 2 : index
    %c0_49 = arith.constant 0 : index
    %43 = tpu.strided_load %arg18[%c2_48, %c0_49] {strides = array<i32: 2, 1>} : memref<18x128xf32, #tpu.memory_space<vmem>>, vector<8x128xf32>
    %44 = arith.maximumf %42, %43 : vector<8x128xf32>
    %c0_50 = arith.constant 0 : index
    %c0_51 = arith.constant 0 : index
    %45 = vector.load %arg4[%c0_50, %c0_51] : memref<128x64xbf16, #tpu.memory_space<vmem>>, vector<128x64xbf16>
    %46 = arith.truncf %44 : vector<8x128xf32> to vector<8x128xbf16>
    %cst_52 = arith.constant dense<0.000000e+00> : vector<8x64xf32>
    %47 = tpu.matmul %46, %45, %cst_52 {dimension_numbers = #tpu.dot_dimension_numbers<[1], [0], [0], [1], [0, 0, 1, 1], [], []>} : vector<8x128xbf16>, vector<128x64xbf16>, vector<8x64xf32> -> vector<8x64xf32>
    %c0_53 = arith.constant 0 : index
    %c0_54 = arith.constant 0 : index
    %48 = vector.load %arg5[%c0_53, %c0_54] : memref<128x64xbf16, #tpu.memory_space<vmem>>, vector<128x64xbf16>
    %49 = arith.truncf %44 : vector<8x128xf32> to vector<8x128xbf16>
    %cst_55 = arith.constant dense<0.000000e+00> : vector<8x64xf32>
    %50 = tpu.matmul %49, %48, %cst_55 {dimension_numbers = #tpu.dot_dimension_numbers<[1], [0], [0], [1], [0, 0, 1, 1], [], []>} : vector<8x128xbf16>, vector<128x64xbf16>, vector<8x64xf32> -> vector<8x64xf32>
    %51 = arith.maximumf %47, %50 : vector<8x64xf32>
    %c1_56 = arith.constant 1 : index
    %c0_57 = arith.constant 0 : index
    %52 = vector.load %arg19[%c1_56, %c0_57] : memref<10x64xf32, #tpu.memory_space<vmem>>, vector<8x64xf32>
    tpu.vector_store %arg19[%c1_56, %c0_57], %51 {strides = array<i32>} : memref<10x64xf32, #tpu.memory_space<vmem>>, vector<8x64xf32>,
    %c0_58 = arith.constant 0 : index
    %c0_59 = arith.constant 0 : index
    %53 = vector.load %arg19[%c0_58, %c0_59] : memref<10x64xf32, #tpu.memory_space<vmem>>, vector<8x64xf32>
    %c0_60 = arith.constant 0 : index
    %c0_61 = arith.constant 0 : index
    %c0_62 = arith.constant 0 : index
    %54 = vector.load %arg6[%c0_60, %c0_61, %c0_62] : memref<3x64x128xbf16, #tpu.memory_space<vmem>>, vector<1x64x128xbf16>
    %55 = vector.shape_cast %54 : vector<1x64x128xbf16> to vector<64x128xbf16>
    %56 = arith.truncf %53 : vector<8x64xf32> to vector<8x64xbf16>
    %cst_63 = arith.constant dense<0.000000e+00> : vector<8x128xf32>
    %57 = tpu.matmul %56, %55, %cst_63 {dimension_numbers = #tpu.dot_dimension_numbers<[1], [0], [0], [1], [0, 0, 1, 1], [], []>} : vector<8x64xbf16>, vector<64x128xbf16>, vector<8x128xf32> -> vector<8x128xf32>
    %c1_64 = arith.constant 1 : index
    %c0_65 = arith.constant 0 : index
    %58 = vector.load %arg19[%c1_64, %c0_65] : memref<10x64xf32, #tpu.memory_space<vmem>>, vector<8x64xf32>
    %c1_66 = arith.constant 1 : index
    %c0_67 = arith.constant 0 : index
    %c0_68 = arith.constant 0 : index
    %59 = vector.load %arg6[%c1_66, %c0_67, %c0_68] : memref<3x64x128xbf16, #tpu.memory_space<vmem>>, vector<1x64x128xbf16>
    %60 = vector.shape_cast %59 : vector<1x64x128xbf16> to vector<64x128xbf16>
    %61 = arith.truncf %58 : vector<8x64xf32> to vector<8x64xbf16>
    %cst_69 = arith.constant dense<0.000000e+00> : vector<8x128xf32>
    %62 = tpu.matmul %61, %60, %cst_69 {dimension_numbers = #tpu.dot_dimension_numbers<[1], [0], [0], [1], [0, 0, 1, 1], [], []>} : vector<8x64xbf16>, vector<64x128xbf16>, vector<8x128xf32> -> vector<8x128xf32>
    %63 = arith.addf %57, %62 : vector<8x128xf32>
    %c2_70 = arith.constant 2 : index
    %c0_71 = arith.constant 0 : index
    %64 = vector.load %arg19[%c2_70, %c0_71] : memref<10x64xf32, #tpu.memory_space<vmem>>, vector<8x64xf32>
    %c2_72 = arith.constant 2 : index
    %c0_73 = arith.constant 0 : index
    %c0_74 = arith.constant 0 : index
    %65 = vector.load %arg6[%c2_72, %c0_73, %c0_74] : memref<3x64x128xbf16, #tpu.memory_space<vmem>>, vector<1x64x128xbf16>
    %66 = vector.shape_cast %65 : vector<1x64x128xbf16> to vector<64x128xbf16>
    %67 = arith.truncf %64 : vector<8x64xf32> to vector<8x64xbf16>
    %cst_75 = arith.constant dense<0.000000e+00> : vector<8x128xf32>
    %68 = tpu.matmul %67, %66, %cst_75 {dimension_numbers = #tpu.dot_dimension_numbers<[1], [0], [0], [1], [0, 0, 1, 1], [], []>} : vector<8x64xbf16>, vector<64x128xbf16>, vector<8x128xf32> -> vector<8x128xf32>
    %69 = arith.addf %63, %68 : vector<8x128xf32>
    %c0_76 = arith.constant 0 : index
    %c0_77 = arith.constant 0 : index
    %70 = vector.load %arg7[%c0_76, %c0_77] : memref<1x128xf32, #tpu.memory_space<vmem>>, vector<1x128xf32>
    %71 = vector.broadcast %70 : vector<1x128xf32> to vector<8x128xf32>
    %72 = arith.addf %69, %71 : vector<8x128xf32>
    %cst_78 = arith.constant 0.000000e+00 : f32
    %73 = vector.broadcast %cst_78 : f32 to vector<8x128xf32>
    %74 = arith.maximumf %72, %73 : vector<8x128xf32>
    %c0_79 = arith.constant 0 : index
    %c0_80 = arith.constant 0 : index
    %75 = vector.load %arg8[%c0_79, %c0_80] : memref<16x8xbf16, #tpu.memory_space<vmem>>, vector<16x8xbf16>
    %76 = arith.truncf %74 : vector<8x128xf32> to vector<8x128xbf16>
    %cst_81 = arith.constant dense<0.000000e+00> : vector<16x128xf32>
    %77 = tpu.matmul %75, %76, %cst_81 {dimension_numbers = #tpu.dot_dimension_numbers<[1], [0], [0], [1], [0, 0, 1, 1], [], []>} : vector<16x8xbf16>, vector<8x128xbf16>, vector<16x128xf32> -> vector<16x128xf32>
    %c1_82 = arith.constant 1 : index
    %c0_83 = arith.constant 0 : index
    %78 = vector.load %arg20[%c1_82, %c0_83] : memref<18x128xf32, #tpu.memory_space<vmem>>, vector<16x128xf32>
    tpu.vector_store %arg20[%c1_82, %c0_83], %77 {strides = array<i32>} : memref<18x128xf32, #tpu.memory_space<vmem>>, vector<16x128xf32>,
    %c0_84 = arith.constant 0 : index
    %c0_85 = arith.constant 0 : index
    %79 = vector.load %arg20[%c0_84, %c0_85] : memref<18x128xf32, #tpu.memory_space<vmem>>, vector<16x128xf32>
    %c0_86 = arith.constant 0 : index
    %c0_87 = arith.constant 0 : index
    %c0_88 = arith.constant 0 : index
    %80 = vector.load %arg9[%c0_86, %c0_87, %c0_88] : memref<3x128x128xbf16, #tpu.memory_space<vmem>>, vector<1x128x128xbf16>
    %81 = vector.shape_cast %80 : vector<1x128x128xbf16> to vector<128x128xbf16>
    %82 = arith.truncf %79 : vector<16x128xf32> to vector<16x128xbf16>
    %cst_89 = arith.constant dense<0.000000e+00> : vector<16x128xf32>
    %83 = tpu.matmul %82, %81, %cst_89 {dimension_numbers = #tpu.dot_dimension_numbers<[1], [0], [0], [1], [0, 0, 1, 1], [], []>} : vector<16x128xbf16>, vector<128x128xbf16>, vector<16x128xf32> -> vector<16x128xf32>
    %c1_90 = arith.constant 1 : index
    %c0_91 = arith.constant 0 : index
    %84 = vector.load %arg20[%c1_90, %c0_91] : memref<18x128xf32, #tpu.memory_space<vmem>>, vector<16x128xf32>
    %c1_92 = arith.constant 1 : index
    %c0_93 = arith.constant 0 : index
    %c0_94 = arith.constant 0 : index
    %85 = vector.load %arg9[%c1_92, %c0_93, %c0_94] : memref<3x128x128xbf16, #tpu.memory_space<vmem>>, vector<1x128x128xbf16>
    %86 = vector.shape_cast %85 : vector<1x128x128xbf16> to vector<128x128xbf16>
    %87 = arith.truncf %84 : vector<16x128xf32> to vector<16x128xbf16>
    %cst_95 = arith.constant dense<0.000000e+00> : vector<16x128xf32>
    %88 = tpu.matmul %87, %86, %cst_95 {dimension_numbers = #tpu.dot_dimension_numbers<[1], [0], [0], [1], [0, 0, 1, 1], [], []>} : vector<16x128xbf16>, vector<128x128xbf16>, vector<16x128xf32> -> vector<16x128xf32>
    %89 = arith.addf %83, %88 : vector<16x128xf32>
    %c2_96 = arith.constant 2 : index
    %c0_97 = arith.constant 0 : index
    %90 = vector.load %arg20[%c2_96, %c0_97] : memref<18x128xf32, #tpu.memory_space<vmem>>, vector<16x128xf32>
    %c2_98 = arith.constant 2 : index
    %c0_99 = arith.constant 0 : index
    %c0_100 = arith.constant 0 : index
    %91 = vector.load %arg9[%c2_98, %c0_99, %c0_100] : memref<3x128x128xbf16, #tpu.memory_space<vmem>>, vector<1x128x128xbf16>
    %92 = vector.shape_cast %91 : vector<1x128x128xbf16> to vector<128x128xbf16>
    %93 = arith.truncf %90 : vector<16x128xf32> to vector<16x128xbf16>
    %cst_101 = arith.constant dense<0.000000e+00> : vector<16x128xf32>
    %94 = tpu.matmul %93, %92, %cst_101 {dimension_numbers = #tpu.dot_dimension_numbers<[1], [0], [0], [1], [0, 0, 1, 1], [], []>} : vector<16x128xbf16>, vector<128x128xbf16>, vector<16x128xf32> -> vector<16x128xf32>
    %95 = arith.addf %89, %94 : vector<16x128xf32>
    %c0_102 = arith.constant 0 : index
    %c0_103 = arith.constant 0 : index
    %96 = vector.load %arg18[%c0_102, %c0_103] : memref<18x128xf32, #tpu.memory_space<vmem>>, vector<16x128xf32>
    %c0_104 = arith.constant 0 : index
    %c0_105 = arith.constant 0 : index
    %c0_106 = arith.constant 0 : index
    %97 = vector.load %arg10[%c0_104, %c0_105, %c0_106] : memref<3x128x128xbf16, #tpu.memory_space<vmem>>, vector<1x128x128xbf16>
    %98 = vector.shape_cast %97 : vector<1x128x128xbf16> to vector<128x128xbf16>
    %99 = arith.truncf %96 : vector<16x128xf32> to vector<16x128xbf16>
    %cst_107 = arith.constant dense<0.000000e+00> : vector<16x128xf32>
    %100 = tpu.matmul %99, %98, %cst_107 {dimension_numbers = #tpu.dot_dimension_numbers<[1], [0], [0], [1], [0, 0, 1, 1], [], []>} : vector<16x128xbf16>, vector<128x128xbf16>, vector<16x128xf32> -> vector<16x128xf32>
    %101 = arith.addf %95, %100 : vector<16x128xf32>
    %c1_108 = arith.constant 1 : index
    %c0_109 = arith.constant 0 : index
    %102 = vector.load %arg18[%c1_108, %c0_109] : memref<18x128xf32, #tpu.memory_space<vmem>>, vector<16x128xf32>
    %c1_110 = arith.constant 1 : index
    %c0_111 = arith.constant 0 : index
    %c0_112 = arith.constant 0 : index
    %103 = vector.load %arg10[%c1_110, %c0_111, %c0_112] : memref<3x128x128xbf16, #tpu.memory_space<vmem>>, vector<1x128x128xbf16>
    %104 = vector.shape_cast %103 : vector<1x128x128xbf16> to vector<128x128xbf16>
    %105 = arith.truncf %102 : vector<16x128xf32> to vector<16x128xbf16>
    %cst_113 = arith.constant dense<0.000000e+00> : vector<16x128xf32>
    %106 = tpu.matmul %105, %104, %cst_113 {dimension_numbers = #tpu.dot_dimension_numbers<[1], [0], [0], [1], [0, 0, 1, 1], [], []>} : vector<16x128xbf16>, vector<128x128xbf16>, vector<16x128xf32> -> vector<16x128xf32>
    %107 = arith.addf %101, %106 : vector<16x128xf32>
    %c2_114 = arith.constant 2 : index
    %c0_115 = arith.constant 0 : index
    %108 = vector.load %arg18[%c2_114, %c0_115] : memref<18x128xf32, #tpu.memory_space<vmem>>, vector<16x128xf32>
    %c2_116 = arith.constant 2 : index
    %c0_117 = arith.constant 0 : index
    %c0_118 = arith.constant 0 : index
    %109 = vector.load %arg10[%c2_116, %c0_117, %c0_118] : memref<3x128x128xbf16, #tpu.memory_space<vmem>>, vector<1x128x128xbf16>
    %110 = vector.shape_cast %109 : vector<1x128x128xbf16> to vector<128x128xbf16>
    %111 = arith.truncf %108 : vector<16x128xf32> to vector<16x128xbf16>
    %cst_119 = arith.constant dense<0.000000e+00> : vector<16x128xf32>
    %112 = tpu.matmul %111, %110, %cst_119 {dimension_numbers = #tpu.dot_dimension_numbers<[1], [0], [0], [1], [0, 0, 1, 1], [], []>} : vector<16x128xbf16>, vector<128x128xbf16>, vector<16x128xf32> -> vector<16x128xf32>
    %113 = arith.addf %107, %112 : vector<16x128xf32>
    %c0_120 = arith.constant 0 : index
    %c0_121 = arith.constant 0 : index
    %114 = vector.load %arg11[%c0_120, %c0_121] : memref<1x128xf32, #tpu.memory_space<vmem>>, vector<1x128xf32>
    %115 = vector.broadcast %114 : vector<1x128xf32> to vector<16x128xf32>
    %116 = arith.addf %113, %115 : vector<16x128xf32>
    %cst_122 = arith.constant 0.000000e+00 : f32
    %117 = vector.broadcast %cst_122 : f32 to vector<16x128xf32>
    %118 = arith.maximumf %116, %117 : vector<16x128xf32>
    %119 = vector.shape_cast %118 : vector<16x128xf32> to vector<1x2048xf32>
    %120 = arith.truncf %119 : vector<1x2048xf32> to vector<1x2048xbf16>
    %c0_123 = arith.constant 0 : index
    %c0_124 = arith.constant 0 : index
    %121 = vector.load %arg12[%c0_123, %c0_124] : memref<2048x32xbf16, #tpu.memory_space<vmem>>, vector<2048x32xbf16>
    %cst_125 = arith.constant dense<0.000000e+00> : vector<1x32xf32>
    %122 = tpu.matmul %120, %121, %cst_125 {dimension_numbers = #tpu.dot_dimension_numbers<[1], [0], [0], [1], [0, 0, 1, 1], [], []>} : vector<1x2048xbf16>, vector<2048x32xbf16>, vector<1x32xf32> -> vector<1x32xf32>
    %c0_126 = arith.constant 0 : index
    %c0_127 = arith.constant 0 : index
    %123 = vector.load %arg13[%c0_126, %c0_127] : memref<1x32xf32, #tpu.memory_space<vmem>>, vector<1x32xf32>
    %124 = arith.addf %122, %123 : vector<1x32xf32>
    %cst_128 = arith.constant 0.000000e+00 : f32
    %125 = vector.broadcast %cst_128 : f32 to vector<1x32xf32>
    %126 = arith.maximumf %124, %125 : vector<1x32xf32>
    %127 = arith.truncf %126 : vector<1x32xf32> to vector<1x32xbf16>
    %c0_129 = arith.constant 0 : index
    %c0_130 = arith.constant 0 : index
    %128 = vector.load %arg14[%c0_129, %c0_130] : memref<32x8xbf16, #tpu.memory_space<vmem>>, vector<32x8xbf16>
    %cst_131 = arith.constant dense<0.000000e+00> : vector<1x8xf32>
    %129 = tpu.matmul %127, %128, %cst_131 {dimension_numbers = #tpu.dot_dimension_numbers<[1], [0], [0], [1], [0, 0, 1, 1], [], []>} : vector<1x32xbf16>, vector<32x8xbf16>, vector<1x8xf32> -> vector<1x8xf32>
    %c0_132 = arith.constant 0 : index
    %c0_133 = arith.constant 0 : index
    %130 = vector.load %arg15[%c0_132, %c0_133] : memref<1x8xf32, #tpu.memory_space<vmem>>, vector<1x8xf32>
    %131 = arith.addf %129, %130 : vector<1x8xf32>
    %c0_134 = arith.constant 0 : index
    %c0_135 = arith.constant 0 : index
    %c0_136 = arith.constant 0 : index
    %132 = vector.load %arg16[%c0_134, %c0_135, %c0_136] : memref<1x1x8xf32, #tpu.memory_space<vmem>>, vector<1x1x8xf32>
    %133 = vector.shape_cast %132 : vector<1x1x8xf32> to vector<1x8xf32>
    %134 = vector.shape_cast %131 : vector<1x8xf32> to vector<1x1x8xf32>
    tpu.vector_store %arg16[%c0_134, %c0_135, %c0_136], %134 {strides = array<i32>} : memref<1x1x8xf32, #tpu.memory_space<vmem>>, vector<1x1x8xf32>,
    return
  }
  func.func @transform_0(%arg0: i32) -> (i32, i32, i32) {
    %c0_i32 = arith.constant 0 : i32
    %c0_i32_0 = arith.constant 0 : i32
    %c0_i32_1 = arith.constant 0 : i32
    return %arg0, %c0_i32, %c0_i32_0 : i32, i32, i32
  }
  func.func @transform_1(%arg0: i32) -> (i32, i32, i32) {
    %c0_i32 = arith.constant 0 : i32
    %c0_i32_0 = arith.constant 0 : i32
    %c0_i32_1 = arith.constant 0 : i32
    %c0_i32_2 = arith.constant 0 : i32
    return %c0_i32, %c0_i32_0, %c0_i32_1 : i32, i32, i32
  }
  func.func @transform_2(%arg0: i32) -> (i32, i32) {
    %c0_i32 = arith.constant 0 : i32
    %c0_i32_0 = arith.constant 0 : i32
    %c0_i32_1 = arith.constant 0 : i32
    return %c0_i32, %c0_i32_0 : i32, i32
  }
  func.func @transform_3(%arg0: i32) -> (i32, i32) {
    %c0_i32 = arith.constant 0 : i32
    %c0_i32_0 = arith.constant 0 : i32
    %c0_i32_1 = arith.constant 0 : i32
    return %c0_i32, %c0_i32_0 : i32, i32
  }
  func.func @transform_4(%arg0: i32) -> (i32, i32) {
    %c0_i32 = arith.constant 0 : i32
    %c0_i32_0 = arith.constant 0 : i32
    %c0_i32_1 = arith.constant 0 : i32
    return %c0_i32, %c0_i32_0 : i32, i32
  }
  func.func @transform_5(%arg0: i32) -> (i32, i32, i32) {
    %c0_i32 = arith.constant 0 : i32
    %c0_i32_0 = arith.constant 0 : i32
    %c0_i32_1 = arith.constant 0 : i32
    %c0_i32_2 = arith.constant 0 : i32
    return %c0_i32, %c0_i32_0, %c0_i32_1 : i32, i32, i32
  }
  func.func @transform_6(%arg0: i32) -> (i32, i32) {
    %c0_i32 = arith.constant 0 : i32
    %c0_i32_0 = arith.constant 0 : i32
    %c0_i32_1 = arith.constant 0 : i32
    return %c0_i32, %c0_i32_0 : i32, i32
  }
  func.func @transform_7(%arg0: i32) -> (i32, i32) {
    %c0_i32 = arith.constant 0 : i32
    %c0_i32_0 = arith.constant 0 : i32
    %c0_i32_1 = arith.constant 0 : i32
    return %c0_i32, %c0_i32_0 : i32, i32
  }
  func.func @transform_8(%arg0: i32) -> (i32, i32, i32) {
    %c0_i32 = arith.constant 0 : i32
    %c0_i32_0 = arith.constant 0 : i32
    %c0_i32_1 = arith.constant 0 : i32
    %c0_i32_2 = arith.constant 0 : i32
    return %c0_i32, %c0_i32_0, %c0_i32_1 : i32, i32, i32
  }
  func.func @transform_9(%arg0: i32) -> (i32, i32, i32) {
    %c0_i32 = arith.constant 0 : i32
    %c0_i32_0 = arith.constant 0 : i32
    %c0_i32_1 = arith.constant 0 : i32
    %c0_i32_2 = arith.constant 0 : i32
    return %c0_i32, %c0_i32_0, %c0_i32_1 : i32, i32, i32
  }
  func.func @transform_10(%arg0: i32) -> (i32, i32) {
    %c0_i32 = arith.constant 0 : i32
    %c0_i32_0 = arith.constant 0 : i32
    %c0_i32_1 = arith.constant 0 : i32
    return %c0_i32, %c0_i32_0 : i32, i32
  }
  func.func @transform_11(%arg0: i32) -> (i32, i32) {
    %c0_i32 = arith.constant 0 : i32
    %c0_i32_0 = arith.constant 0 : i32
    %c0_i32_1 = arith.constant 0 : i32
    return %c0_i32, %c0_i32_0 : i32, i32
  }
  func.func @transform_12(%arg0: i32) -> (i32, i32) {
    %c0_i32 = arith.constant 0 : i32
    %c0_i32_0 = arith.constant 0 : i32
    %c0_i32_1 = arith.constant 0 : i32
    return %c0_i32, %c0_i32_0 : i32, i32
  }
  func.func @transform_13(%arg0: i32) -> (i32, i32) {
    %c0_i32 = arith.constant 0 : i32
    %c0_i32_0 = arith.constant 0 : i32
    %c0_i32_1 = arith.constant 0 : i32
    return %c0_i32, %c0_i32_0 : i32, i32
  }
  func.func @transform_14(%arg0: i32) -> (i32, i32) {
    %c0_i32 = arith.constant 0 : i32
    %c0_i32_0 = arith.constant 0 : i32
    %c0_i32_1 = arith.constant 0 : i32
    return %c0_i32, %c0_i32_0 : i32, i32
  }
  func.func @transform_15(%arg0: i32) -> (i32, i32, i32) {
    %c0_i32 = arith.constant 0 : i32
    %c0_i32_0 = arith.constant 0 : i32
    %c0_i32_1 = arith.constant 0 : i32
    return %arg0, %c0_i32, %c0_i32_0 : i32, i32, i32
  }
}

</mosaic_0001>

<bundles_post_ra>
// kernel: unet_dnn_forward.1
= control target key start
LH: loop header
LB: loop body
LE: loop exit
PB: predicated region body
PF: predicated region fallthrough
CT: control target
= control target key end

     0   :  { %s5775_s0 = inlined_call_operand.vmem [shape: f32[2,16,64], index: 0, kind: input, shape index: {}]   ;;  %s5776_s1 = inlined_call_operand.vmem [shape: bf16[3,64,128], index: 1, kind: input, shape index: {}]   ;;  %s5777_s2 = inlined_call_operand.vmem [shape: f32[1,128], index: 2, kind: input, shape index: {}]   ;;  %s5778_s3 = inlined_call_operand.vmem [shape: bf16[128,64], index: 3, kind: input, shape index: {}]   ;;  %s5779_s4 = inlined_call_operand.vmem [shape: bf16[128,64], index: 4, kind: input, shape index: {}]   ;;  %s5780_s5 = inlined_call_operand.vmem [shape: bf16[3,64,128], index: 5, kind: input, shape index: {}]   ;;  %s5781_s6 = inlined_call_operand.vmem [shape: f32[1,128], index: 6, kind: input, shape index: {}]   ;;  %s5782_s7 = inlined_call_operand.vmem [shape: bf16[16,8], index: 7, kind: input, shape index: {}]   ;;  %s5783_s8 = inlined_call_operand.vmem [shape: bf16[3,128,128], index: 8, kind: input, shape index: {}]   ;;  %s5784_s9 = inlined_call_operand.vmem [shape: bf16[3,128,128], index: 9, kind: input, shape index: {}]   ;;  %s5785_s10 = inlined_call_operand.vmem [shape: f32[1,128], index: 10, kind: input, shape index: {}]   ;;  %s5786_s11 = inlined_call_operand.vmem [shape: bf16[2048,32], index: 11, kind: input, shape index: {}]   ;;  %s5787_s12 = inlined_call_operand.vmem [shape: f32[1,32], index: 12, kind: input, shape index: {}]   ;;  %s5788_s13 = inlined_call_operand.vmem [shape: bf16[32,8], index: 13, kind: input, shape index: {}]   ;;  %s5789_s14 = inlined_call_operand.vmem [shape: f32[1,8], index: 14, kind: input, shape index: {}]   ;;  %s5790_s15 = inlined_call_operand.hbm [shape: f32[2,1,8], index: 15, kind: output, shape index: {}]  }
   0x1   :  { %5792 = sst [smem:[#allocation11_spill]] %s5775_s0 }
   0x2   :  { %5793 = sst [smem:[#allocation12_spill]] %s5776_s1 }
   0x3   :  { %5794 = sst [smem:[#allocation13_spill]] %s5777_s2 }
   0x4   :  { %5795 = sst [smem:[#allocation14_spill]] %s5778_s3 }
   0x5   :  { %20 = vsyncpa [#allocation7], 0 }
   0x6   :  { %22 = vsyncpa [#allocation7 + $0x1], 0  ;;  %s4798_s18 = smov 0   ;;  %s4800_s19 = smov 0  }
   0x7   :  { %s4802_s20 = smov 0   ;;  %s4804_s21 = smov 0  }
   0x8 LB: > { %5796 = sst [smem:[#allocation9_spill]] %s4709_s20  ;;  %s4819_s22 = sadd.s32 4294967295, %s4713_s21   ;;  %s4713_s21 = sphi %s4804_s21, %s5808_s21   ;;  %s4709_s20 = sphi %s4802_s20, %s5805_s20   ;;  %s4705_s19 = sphi %s4800_s19, %s5807_s19   ;;  %s4701_s18 = sphi %s4798_s18, %s5806_s18  }
   0x9   : > { %s3526_s23 = sadd.s32 4294967294, %s4713_s21   ;;  %s4823_s24 = sadd.s32 1, %s4713_s21  }
   0xa   : > { %s355_s25 = sadd.s32 1, %s4709_s20  ;;  %s352_s26 = ssub.s32 %s4713_s21, %s4823_s24 }
   0xb   : > { %p365_p0 = scmp.ne.s32.totalorder %s4709_s20, %s4705_s19  ;;  %p353_p1 = scmp.eq.s32.totalorder %s352_s26, 0 }
   0xc   : > { %p366_p2 = scmp.eq.s32.totalorder %s4819_s22, 1  ;;  %p371_p3 = scmp.ne.s32.totalorder %s4705_s19, %s4701_s18 }
   0xd   : > { %p372_p4 = scmp.eq.s32.totalorder %s3526_s23, 1  ;;  %p3529_p7 = scmp.ge.s32.totalorder %s4713_s21, 1 }
   0xe   : > { %s4834_s27 = scalar_select %p353_p1, %s4709_s20, %s355_s25  }
   0xf   : > { %p4836_p5 = por %p366_p2, %p365_p0  ;;  %p4840_p6 = por %p372_p4, %p371_p3 }
  0x10   : > { %5797 = sst [smem:[#allocation10_spill]] %s4834_s27  ;;  %p440_p8 = scmp.lt.s32.totalorder %s4713_s21, 3 }
  0x12   : > { %p441_p9 = pnand %p3529_p7, %p440_p8 }
  0x13   : > { %s5800_s1 = sld [smem:[#allocation12_spill]] (!%p441_p9)  ;;  %v4715_v1 = vmov (!%p441_p9), 0.0   ;;  %vm4716_vm0 = vmmov (!%p441_p9), 0   ;;  %p487_p10 = scmp.lt.s32.totalorder (!%p441_p9), %s4819_s22, 1  ;;  %vm504_vm1 = vcmask (!%p441_p9), 523264   ;;  %vm493_vm2 = vcmask (!%p441_p9), 516096  }
  0x14   : > { %444 = sbr.rel (%p441_p9) target bundleno = 1812 (0x714), region = 80  ;;  %4145 = vmatprep.subr.bf16.mxu0 (!%p441_p9), %v4715_v1  ;;  %496 = vst [vmem:[#allocation3] sm:$0x1] (!%p441_p9), %v4715_v1  ;;  %497 = vst [vmem:[#allocation3 + $0x11] sm:$0x1] (!%p441_p9), %v4715_v1  ;;  %4157 = vmatprep.subr.bf16.mxu1 (!%p441_p9), %v4715_v1  ;;  %s5801_s0 = sld [smem:[#allocation11_spill]] (!%p441_p9) }
  0x15   : > { %500 = vst [vmem:[#allocation5] sm:$0x1] (!%p441_p9), %v4715_v1  ;;  %501 = vst [vmem:[#allocation5 + $0x11] sm:$0x1] (!%p441_p9), %v4715_v1  ;;  %4153 = vmatprep.mubr.msk.bf16.mxu0 (!%p441_p9), %vm4716_vm0, %v4715_v1  ;;  %4165 = vmatprep.mubr.msk.bf16.mxu1 (!%p441_p9), %vm4716_vm0, %v4715_v1  ;;  %s5802_s3 = sld [smem:[#allocation14_spill]] (!%p441_p9)  ;;  %v4445_v25 = vld [vmem:[%s5779_s4] sm:$0xff] (!%p441_p9)  }
  0x16   : > { %494 = vst.msk [vmem:[#allocation2] sm:$0x1] (!%p441_p9), %vm493_vm2, %v4715_v1  ;;  %495 = vst.msk [vmem:[#allocation2 + $0x11] sm:$0x1] (!%p441_p9), %vm493_vm2, %v4715_v1  ;;  %v4447_v27 = vld [vmem:[%s5779_s4 + $0x8] sm:$0xff] (!%p441_p9)   ;;  %v4449_v29 = vld [vmem:[%s5779_s4 + $0x10] sm:$0xff] (!%p441_p9)  }
  0x17   : > { %498 = vst.msk [vmem:[#allocation4] sm:$0x1] (!%p441_p9), %vm493_vm2, %v4715_v1  ;;  %499 = vst.msk [vmem:[#allocation4 + $0x9] sm:$0x1] (!%p441_p9), %vm493_vm2, %v4715_v1  ;;  %v4451_v31 = vld [vmem:[%s5779_s4 + $0x18] sm:$0xff] (!%p441_p9)   ;;  %v4453_v33 = vld [vmem:[%s5779_s4 + $0x20] sm:$0xff] (!%p441_p9)  }
  0x18   : > { %v4455_v35 = vld [vmem:[%s5779_s4 + $0x28] sm:$0xff] (!%p441_p9)   ;;  %v4457_v37 = vld [vmem:[%s5779_s4 + $0x30] sm:$0xff] (!%p441_p9)   ;;  %v4459_v39 = vld [vmem:[%s5779_s4 + $0x38] sm:$0xff] (!%p441_p9)   ;;  %s5803_s2 = sld [smem:[#allocation13_spill]] (!%p441_p9)  ;;  %vm1232_vm3 = vcmask (!%p441_p9), 1043456   ;;  %vm1228_vm4 = vcmask (!%p441_p9), 64512  }
  0x19   : > { %v4432_v0 = vld [vmem:[%s5800_s1 + $0x20] sm:$0xff] (!%p441_p9)   ;;  %v4434_v3 = vld [vmem:[%s5800_s1 + $0x28] sm:$0xff] (!%p441_p9)   ;;  %v4436_v5 = vld [vmem:[%s5800_s1 + $0x30] sm:$0xff] (!%p441_p9)   ;;  %vm3412_vm5 = vcmask (!%p441_p9), 261120   ;;  %s485_s30 = sand.u32 (!%p441_p9), 1, %s4705_s19   ;;  %s3858_s27 = sshll.u32 (!%p441_p9), %s4819_s22, 4 }
  0x1a   : > { %v4433_v2 = vld [vmem:[%s5800_s1] sm:$0xff] (!%p441_p9)   ;;  %4146 = vmatpush3.bf16.msra.mxu0 (!%p441_p9), %v4432_v0  ;;  %v4435_v4 = vld [vmem:[%s5800_s1 + $0x8] sm:$0xff] (!%p441_p9)   ;;  %v4437_v6 = vld [vmem:[%s5800_s1 + $0x10] sm:$0xff] (!%p441_p9)   ;;  %vm3456_vm6 = vcmask (!%p441_p9), 57344  }
  0x1b   : > { %4158 = vmatpush3.bf16.msra.mxu1 %v4433_v2  ;;  %4147 = vmatprep.subr.bf16.mxu0 %v4715_v1  ;;  %s488_s17 = scalar_select %p487_p10, %s4819_s22, 1  ;;  %v4438_v9 = vld [vmem:[%s5800_s1 + $0x38] sm:$0xff]   ;;  %v4440_v11 = vld [vmem:[%s5800_s1 + $0x40] sm:$0xff]   ;;  %v4441_v18 = vld [vmem:[%s5800_s1 + $0x48] sm:$0xff]  }
  0x1c   : > { %4159 = vmatprep.subr.bf16.mxu1 %v4715_v1  ;;  %v4439_v10 = vld [vmem:[%s5800_s1 + $0x18] sm:$0xff]   ;;  %v4442_v19 = vld [vmem:[%s5800_s1 + $0x50] sm:$0xff]   ;;  %v4444_v24 = vld [vmem:[%s5802_s3] sm:$0xff]   ;;  %s3459_s22 = scalar_lea.sflag [#allocation7], %s485_s30 }
  0x1d   : > { %s3861_s26 = sshll.u32 %s488_s17, 4  ;;  %v4443_v20 = vld [vmem:[%s5800_s1 + $0x58] sm:$0xff]   ;;  %v4446_v26 = vld [vmem:[%s5802_s3 + $0x8] sm:$0xff]   ;;  %v4448_v28 = vld [vmem:[%s5802_s3 + $0x10] sm:$0xff]   ;;  %s4717_s17 = smov [#allocation6]  }
  0x1e   : > { %4148 = vmatpush3.bf16.msra.mxu0 %v4434_v3  ;;  %s491_s23 = scalar_lea.vmem %s5801_s0, %s3861_s26  ;;  %v4450_v30 = vld [vmem:[%s5802_s3 + $0x18] sm:$0xff]   ;;  %v4452_v32 = vld [vmem:[%s5802_s3 + $0x20] sm:$0xff]   ;;  %v4454_v34 = vld [vmem:[%s5802_s3 + $0x28] sm:$0xff]   ;;  %s486_s0 = scalar_lea.vmem [#allocation6], %s485_s30 }
  0x1f   : > { %4160 = vmatpush3.bf16.msra.mxu1 %v4435_v4  ;;  %4149 = vmatprep.subr.bf16.mxu0 %v4715_v1  ;;  %v502_v7 = vld [vmem:[%s491_s23] sm:$0xff]  ;;  %v503_v8 = vld [vmem:[%s491_s23 + $0x8] sm:$0xff]  ;;  %v4456_v36 = vld [vmem:[%s5802_s3 + $0x30] sm:$0xff]   ;;  %s3471_s1 = sshll.u32 %s486_s0, 4  ;;  %s5733_s26 = scalar_lea.hbm %s5790_s15, %s3858_s27  ;;  %s5735_s1 = int_to_ptr.vmem [resolvable:$true] %s3471_s1 }
  0x20   : > { %4161 = vmatprep.subr.bf16.mxu1 %v4715_v1  ;;  %505 = vst.msk [vmem:[#allocation2 + $0x1] sm:$0xff] %vm504_vm1, %v502_v7  ;;  %506 = vst.msk [vmem:[#allocation2 + $0x9] sm:$0xff] %vm504_vm1, %v503_v8  ;;  %v4458_v38 = vld [vmem:[%s5802_s3 + $0x38] sm:$0xff]   ;;  %v3563_v51 = vld [vmem:[%s5803_s2] ss:$0 sm:$0xff]  ;;  %s4651_s23 = scalar_lea.vmem %s5735_s1, 16 }
  0x21   : > { %v4460_v2 = vld [vmem:[%s5780_s5 + $0x20] sm:$0xff]   ;;  %v4464_v7 = vld [vmem:[%s5780_s5 + $0x30] sm:$0xff]   ;;  %p4652_p11 = scmp.ne.s32.totalorder %s5735_s1, %s4651_s23  ;;  %s4655_s25 = sshll.u32 %s4717_s17, 4  ;;  %s4656_s25 = int_to_ptr.vmem [resolvable:$false] %s4655_s25 }
  0x22   : > { %4150 = vmatpush3.bf16.msra.mxu0 %v4436_v5  ;;  %v4461_v3 = vld [vmem:[%s5780_s5] sm:$0xff]   ;;  %v4462_v5 = vld [vmem:[%s5780_s5 + $0x28] sm:$0xff]   ;;  %v4465_v8 = vld [vmem:[%s5780_s5 + $0x10] sm:$0xff]   ;;  %s4657_s16 = scalar_lea.vmem %s4656_s25, 32  ;;  %p4658_p0 = scmp.lt.s32.totalorder %s5735_s1, %s4656_s25 }
  0x23   : > { %4162 = vmatpush3.bf16.msra.mxu1 %v4437_v6  ;;  %4151 = vmatprep.subr.bf16.mxu0 %v4715_v1  ;;  %v4463_v6 = vld [vmem:[%s5780_s5 + $0x8] sm:$0xff]   ;;  %p4653_p12 = pnand %p4652_p11, %p4836_p5  ;;  %p4659_p1 = scmp.lt.s32.totalorder %s4657_s16, %s4651_s23 }
  0x24   : > { %4163 = vmatprep.subr.bf16.mxu1 %v4715_v1 }
  0x25   : > { %p4654_p13 = pneg %p4653_p12  ;;  %p4660_p2 = por %p4659_p1, %p4658_p0 }
  0x26   : > { %4152 = vmatpush3.bf16.msra.mxu0 %v4438_v9  ;;  %v4466_v9 = vld [vmem:[%s5780_s5 + $0x38] sm:$0xff]  }
  0x27   : > { %4164 = vmatpush3.bf16.msra.mxu1 %v4439_v10  ;;  %4169 = vmatprep.subr.bf16.mxu0 %v4715_v1  ;;  %v518_v12 = vld [vmem:[#allocation2 + $0x1] sm:$0xff]  ;;  %v519_v13 = vld [vmem:[#allocation2 + $0x9] sm:$0xff]  ;;  %v4467_v10 = vld [vmem:[%s5780_s5 + $0x18] sm:$0xff]   ;;  %p4661_p3 = pnand %p4660_p2, %p4654_p13 }
  0x28   : > { %v507_v14 = vld [vmem:[#allocation2] sm:$0xff]  ;;  %4181 = vmatprep.subr.bf16.mxu1 %v4715_v1  ;;  %v529_v15 = vpack.c.bf16 %v519_v13, %v518_v12  ;;  %v508_v16 = vld [vmem:[#allocation2 + $0x8] sm:$0xff] }
  0x29   : > { %v517_v17 = vpack.c.bf16 %v508_v16, %v507_v14  ;;  %v666_v21 = vld [vmem:[#allocation2 + $0x2] sm:$0xff]  ;;  %v667_v22 = vld [vmem:[#allocation2 + $0xa] sm:$0xff] }
  0x2a   : > { %4154 = vmatmul.mubr.msk.bf16.vlgmr.msra.gmra.mrb[0].mxu0 %vm504_vm1, %v529_v15  ;;  %v677_v23 = vpack.c.bf16 %v667_v22, %v666_v21  ;;  %v4468_v22 = vld [vmem:[%s5780_s5 + $0x40] sm:$0xff]  }
  0x2b   : > { %4166 = vmatmul.mubr.msk.bf16.vlgmr.msra.gmra.mrb[0].mxu1 %vm504_vm1, %v517_v17  ;;  %4170 = vmatpush3.bf16.msra.mxu0 %v4440_v11 }
  0x2c   : > { %4171 = vmatprep.subr.bf16.mxu0 %v4715_v1  ;;  %4177 = vmatprep.mubr.msk.bf16.mxu0 %vm4716_vm0, %v4715_v1 }
  0x2d   : > { %4197 = vmatprep.mubr.msk.bf16.mxu1 %vm4716_vm0, %v4715_v1  ;;  %4182 = vmatpush3.bf16.msra.mxu1 %v4444_v24 }
  0x2e   : > { %4183 = vmatprep.subr.bf16.mxu1 %v4715_v1 }
  0x2f   : > { %4172 = vmatpush3.bf16.msra.mxu0 %v4441_v18 }
  0x30   : > { %4173 = vmatprep.subr.bf16.mxu0 %v4715_v1 }
  0x31   : > { %4184 = vmatpush3.bf16.msra.mxu1 %v4446_v26  ;;  %v4470_v26 = vld [vmem:[%s5780_s5 + $0x50] sm:$0xff]  }
  0x32   : > { %4185 = vmatprep.subr.bf16.mxu1 %v4715_v1 }
  0x33   : > { %4174 = vmatpush3.bf16.msra.mxu0 %v4442_v19 }
  0x34   : > { %4175 = vmatprep.subr.bf16.mxu0 %v4715_v1 }
  0x35   : > { %4186 = vmatpush3.bf16.msra.mxu1 %v4448_v28 }
  0x36   : > { %4187 = vmatprep.subr.bf16.mxu1 %v4715_v1 }
  0x37   : > { %4176 = vmatpush3.bf16.msra.mxu0 %v4443_v20 }
  0x38   : > { %4201 = vmatprep.subr.bf16.mxu0 %v4715_v1 }
  0x39   : > { %4188 = vmatpush3.bf16.msra.mxu1 %v4450_v30  ;;  %v4473_v30 = vld [vmem:[%s5783_s8 + $0x40] sm:$0xff]  }
  0x3a   : > { %4178 = vmatmul.mubr.msk.bf16.vlgmr.msra.gmra.mrb[4].mxu0 %vm504_vm1, %v677_v23  ;;  %4189 = vmatprep.subr.bf16.mxu1 %v4715_v1 }
  0x3b   : > { %4217 = vmatprep.mubr.msk.bf16.mxu0 %vm4716_vm0, %v4715_v1  ;;  %4202 = vmatpush3.bf16.msra.mxu0 %v4445_v25  ;;  %v4469_v25 = vld [vmem:[%s5780_s5 + $0x48] sm:$0xff]  }
  0x3c   : > { %4203 = vmatprep.subr.bf16.mxu0 %v4715_v1 }
  0x3d   : > { %4190 = vmatpush3.bf16.msra.mxu1 %v4452_v32  ;;  %v4477_v32 = vld [vmem:[%s5783_s8 + $0x50] sm:$0xff]  }
  0x3e   : > { %4191 = vmatprep.subr.bf16.mxu1 %v4715_v1 }
  0x3f   : > { %4204 = vmatpush3.bf16.msra.mxu0 %v4447_v27  ;;  %v4471_v27 = vld [vmem:[%s5780_s5 + $0x58] sm:$0xff]  }
  0x40   : > { %4205 = vmatprep.subr.bf16.mxu0 %v4715_v1 }
  0x41   : > { %4192 = vmatpush3.bf16.msra.mxu1 %v4454_v34  ;;  %v4481_v34 = vld [vmem:[%s5783_s8 + $0x60] sm:$0xff]  }
  0x42   : > { %4193 = vmatprep.subr.bf16.mxu1 %v4715_v1 }
  0x43   : > { %4206 = vmatpush3.bf16.msra.mxu0 %v4449_v29 }
  0x44   : > { %4207 = vmatprep.subr.bf16.mxu0 %v4715_v1 }
  0x45   : > { %4194 = vmatpush3.bf16.msra.mxu1 %v4456_v36 }
  0x46   : > { %4195 = vmatprep.subr.bf16.mxu1 %v4715_v1 }
  0x47   : > { %4208 = vmatpush3.bf16.msra.mxu0 %v4451_v31  ;;  %v4475_v31 = vld [vmem:[%s5783_s8 + $0x48] sm:$0xff]  }
  0x48   : > { %4209 = vmatprep.subr.bf16.mxu0 %v4715_v1 }
  0x49   : > { %4196 = vmatpush3.bf16.msra.mxu1 %v4458_v38 }
  0x4a   : > { %4221 = vmatprep.subr.bf16.mxu1 %v4715_v1 }
  0x4b   : > { %4210 = vmatpush3.bf16.msra.mxu0 %v4453_v33  ;;  %v4479_v33 = vld [vmem:[%s5783_s8 + $0x58] sm:$0xff]  }
  0x4c   : > { %4211 = vmatprep.subr.bf16.mxu0 %v4715_v1 }
  0x4f   : > { %4212 = vmatpush3.bf16.msra.mxu0 %v4455_v35 }
  0x50   : > { %4213 = vmatprep.subr.bf16.mxu0 %v4715_v1 }
  0x53   : > { %4214 = vmatpush3.bf16.msra.mxu0 %v4457_v37 }
  0x54   : > { %4215 = vmatprep.subr.bf16.mxu0 %v4715_v1 }
  0x57   : > { %4216 = vmatpush3.bf16.msra.mxu0 %v4459_v39 }
  0x58   : > { %4233 = vmatprep.subr.bf16.mxu0 %v4715_v1 }
  0xfd   : > { %v591_v40 = vpop.f32.mrb[0].mxu0 }
  0xfe   : > { %v659_v41 = vpop.f32.mrb[0].mxu1  ;;  %v4155_v42 = vpop.f32.mrb[1].mxu0 }
  0xff   : > { %v660_v43 = vadd.f32 %v659_v41, %v591_v40  ;;  %v4167_v44 = vpop.f32.mrb[1].mxu1  ;;  %v594_v45 = vpop.f32.mrb[2].mxu0 }
 0x100   : > { %v662_v46 = vpop.f32.mrb[2].mxu1  ;;  %v4156_v47 = vpop.f32.mrb[3].mxu0 }
 0x101   : > { %v663_v48 = vadd.f32 %v662_v46, %v594_v45  ;;  %v4168_v49 = vpop.f32.mrb[3].mxu1  ;;  %v3611_v45 = vld [vmem:[%s5781_s6] ss:$0 sm:$0xff] }
 0x10d   : > { %v739_v50 = vpop.f32.mrb[4].mxu0 }
 0x10e   : > { %v746_v52 = vadd.f32 %v739_v50, %v660_v43  ;;  %v4179_v53 = vpop.f32.mrb[5].mxu0 }
 0x10f   : > { %v742_v54 = vpop.f32.mrb[6].mxu0 }
 0x110   : > { %v755_v55 = vadd.f32 %v3563_v51, %v746_v52  ;;  %v747_v56 = vadd.f32 %v742_v54, %v663_v48  ;;  %v4180_v57 = vpop.f32.mrb[7].mxu0  ;;  %v4472_v54 = vld [vmem:[%s5782_s7] sm:$0xff]  }
 0x111   : > { %v4478_v57 = vld [vmem:[%s5783_s8 + $0x10] sm:$0xff]  }
 0x112   : > { %v757_v58 = vmax.f32 %v755_v55, 0.0  ;;  %v756_v59 = vadd.f32 %v3563_v51, %v747_v56  ;;  %v4474_v55 = vld [vmem:[%s5783_s8] sm:$0xff]   ;;  %v4476_v56 = vld [vmem:[%s5783_s8 + $0x8] sm:$0xff]  }
 0x114   : > { %759 = vst [vmem:[#allocation3 + $0x1] sm:$0xff] %v757_v58  ;;  %v758_v60 = vmax.f32 %v756_v59, 0.0  ;;  %v4482_v59 = vld [vmem:[%s5783_s8 + $0x20] sm:$0xff]  }
 0x116   : > { %760 = vst [vmem:[#allocation3 + $0x9] sm:$0xff] %v758_v60  ;;  %v4991_v61 = vpack.c.bf16 %v758_v60, %v757_v58  ;;  %v4480_v58 = vld [vmem:[%s5783_s8 + $0x18] sm:$0xff]   ;;  %v4483_v60 = vld [vmem:[%s5783_s8 + $0x68] sm:$0xff]  }
 0x11d   : > { %v762_v62 = vld [vmem:[#allocation3 + $0x1] ss:$2 sm:$0xff]  ;;  %v764_v63 = vld [vmem:[#allocation3 + $0x2] ss:$2 sm:$0xff] }
 0x11e   : > { %v765_v0 = vmax.f32 %v762_v62, %v764_v63  ;;  %v4485_v62 = vld [vmem:[%s5783_s8 + $0x70] sm:$0xff]   ;;  %v4484_v63 = vld [vmem:[%s5783_s8 + $0x28] sm:$0xff]  }
 0x120   : > { %v782_v4 = vpack.c.bf16 %v765_v0, %v765_v0  ;;  %v4487_v0 = vld [vmem:[%s5783_s8 + $0x78] sm:$0xff]  }
 0x122   : > { %4198 = vmatmul.mubr.bf16.vlgmr.msra.gmra.mrb[4].mxu1 %v782_v4  ;;  %4218 = vmatmul.mubr.bf16.vlgmr.msra.gmra.mrb[8].mxu0 %v782_v4 }
 0x123   : > { %4222 = vmatpush3.bf16.msra.mxu1 %v4460_v2  ;;  %4234 = vmatpush3.bf16.msra.mxu0 %v4461_v3  ;;  %v4486_v2 = vld [vmem:[%s5783_s8 + $0x30] sm:$0xff]   ;;  %v4488_v3 = vld [vmem:[%s5783_s8 + $0x38] sm:$0xff]  }
 0x124   : > { %4223 = vmatprep.subr.bf16.mxu1 %v4715_v1  ;;  %4235 = vmatprep.subr.bf16.mxu0 %v4715_v1 }
 0x125   : > { %4229 = vmatprep.mubr.msk.bf16.mxu1 %vm4716_vm0, %v4715_v1  ;;  %4241 = vmatprep.mubr.msk.bf16.mxu0 %vm4716_vm0, %v4715_v1 }
 0x127   : > { %4224 = vmatpush3.bf16.msra.mxu1 %v4462_v5  ;;  %4236 = vmatpush3.bf16.msra.mxu0 %v4463_v6 }
 0x128   : > { %4225 = vmatprep.subr.bf16.mxu1 %v4715_v1  ;;  %4237 = vmatprep.subr.bf16.mxu0 %v4715_v1 }
 0x12b   : > { %4226 = vmatpush3.bf16.msra.mxu1 %v4464_v7  ;;  %4238 = vmatpush3.bf16.msra.mxu0 %v4465_v8  ;;  %v4489_v7 = vld [vmem:[%s5783_s8 + $0x80] sm:$0xff]  }
 0x12c   : > { %4227 = vmatprep.subr.bf16.mxu1 %v4715_v1  ;;  %4239 = vmatprep.subr.bf16.mxu0 %v4715_v1 }
 0x12f   : > { %4228 = vmatpush3.bf16.msra.mxu1 %v4466_v9  ;;  %4240 = vmatpush3.bf16.msra.mxu0 %v4467_v10  ;;  %v4491_v10 = vld [vmem:[%s5783_s8 + $0x88] sm:$0xff]  }
 0x130   : > { %4245 = vmatprep.subr.bf16.mxu1 %v4715_v1  ;;  %4257 = vmatprep.subr.bf16.mxu0 %v4715_v1 }
 0x1f5   : > { %v865_v11 = vpop.f32.mrb[4].mxu1  ;;  %v969_v12 = vpop.f32.mrb[8].mxu0 }
 0x1f6   : > { %v975_v13 = vmax.f32 %v865_v11, %v969_v12  ;;  %v4199_v14 = vpop.f32.mrb[5].mxu1  ;;  %v4219_v15 = vpop.f32.mrb[9].mxu0  ;;  %v4490_v11 = vld [vmem:[%s5784_s9] sm:$0xff]  }
 0x1f7   : > { %v868_v16 = vpop.f32.mrb[6].mxu1  ;;  %v972_v17 = vpop.f32.mrb[10].mxu0  ;;  %v4493_v14 = vld [vmem:[%s5783_s8 + $0x90] sm:$0xff]  }
 0x1f8   : > { %976 = vst.msk [vmem:[#allocation4 + $0x1] sm:$0xff] %vm504_vm1, %v975_v13  ;;  %v4200_v18 = vpop.f32.mrb[7].mxu1  ;;  %v4220_v19 = vpop.f32.mrb[11].mxu0  ;;  %v4492_v16 = vld [vmem:[%s5784_s9 + $0x8] sm:$0xff]   ;;  %v4495_v17 = vld [vmem:[%s5783_s8 + $0x98] sm:$0xff]  }
 0x1f9   : > { %v4494_v18 = vld [vmem:[%s5784_s9 + $0x10] sm:$0xff]   ;;  %v4497_v19 = vld [vmem:[%s5783_s8 + $0xa0] sm:$0xff]  }
 0x1ff   : > { %v987_v20 = vld [vmem:[#allocation4 + $0x1] sm:$0xff] }
 0x200   : > { %v977_v21 = vld [vmem:[#allocation4] sm:$0xff]  ;;  %v997_v23 = vpack.c.bf16 %v987_v20, %v987_v20  ;;  %v4496_v20 = vld [vmem:[%s5784_s9 + $0x18] sm:$0xff]  }
 0x201   : > { %v986_v24 = vpack.c.bf16 %v977_v21, %v977_v21  ;;  %v1132_v28 = vld [vmem:[#allocation4 + $0x2] sm:$0xff]  ;;  %v4499_v21 = vld [vmem:[%s5783_s8 + $0xa8] sm:$0xff]  }
 0x202   : > { %4230 = vmatmul.mubr.msk.bf16.vlgmr.msra.gmra.mrb[8].mxu1 %vm504_vm1, %v997_v23  ;;  %v1142_v29 = vpack.c.bf16 %v1132_v28, %v1132_v28  ;;  %v4501_v23 = vld [vmem:[%s5783_s8 + $0xb0] sm:$0xff]  }
 0x203   : > { %4242 = vmatmul.mubr.msk.bf16.vlgmr.msra.gmra.mrb[12].mxu0 %vm504_vm1, %v986_v24  ;;  %4246 = vmatpush3.bf16.msra.mxu1 %v4468_v22  ;;  %v4498_v22 = vld [vmem:[%s5784_s9 + $0x20] sm:$0xff]   ;;  %v4500_v24 = vld [vmem:[%s5784_s9 + $0x28] sm:$0xff]   ;;  %v4502_v28 = vld [vmem:[%s5784_s9 + $0x30] sm:$0xff]  }
 0x204   : > { %4253 = vmatprep.mubr.msk.bf16.mxu1 %vm4716_vm0, %v4715_v1  ;;  %4247 = vmatprep.subr.bf16.mxu1 %v4715_v1 }
 0x205   : > { %4259 = vmatprep.mubr.msk.bf16.mxu0 %vm4716_vm0, %v4715_v1 }
 0x207   : > { %4248 = vmatpush3.bf16.msra.mxu1 %v4469_v25  ;;  %v4503_v25 = vld [vmem:[%s5783_s8 + $0xb8] sm:$0xff]  }
 0x208   : > { %4249 = vmatprep.subr.bf16.mxu1 %v4715_v1 }
 0x20b   : > { %4250 = vmatpush3.bf16.msra.mxu1 %v4470_v26 }
 0x20c   : > { %4251 = vmatprep.subr.bf16.mxu1 %v4715_v1 }
 0x20f   : > { %4252 = vmatpush3.bf16.msra.mxu1 %v4471_v27 }
 0x210   : > { %4263 = vmatprep.subr.bf16.mxu1 %v4715_v1 }
 0x212   : > { %4254 = vmatmul.mubr.msk.bf16.vlgmr.msra.gmra.mrb[12].mxu1 %vm504_vm1, %v1142_v29  ;;  %v4505_v29 = vld [vmem:[%s5784_s9 + $0x40] sm:$0xff]  }
 0x213   : > { %4279 = vmatprep.mubr.msk.bf16.mxu1 %vm4716_vm0, %v4715_v1  ;;  %4264 = vmatpush3.bf16.msra.mxu1 %v4473_v30 }
 0x214   : > { %4265 = vmatprep.subr.bf16.mxu1 %v4715_v1 }
 0x217   : > { %4266 = vmatpush3.bf16.msra.mxu1 %v4475_v31  ;;  %v4504_v31 = vld [vmem:[%s5784_s9 + $0x38] sm:$0xff]  }
 0x218   : > { %4267 = vmatprep.subr.bf16.mxu1 %v4715_v1 }
 0x21b   : > { %4268 = vmatpush3.bf16.msra.mxu1 %v4477_v32  ;;  %v4507_v32 = vld [vmem:[%s5784_s9 + $0x48] sm:$0xff]  }
 0x21c   : > { %4269 = vmatprep.subr.bf16.mxu1 %v4715_v1 }
 0x21f   : > { %4270 = vmatpush3.bf16.msra.mxu1 %v4479_v33  ;;  %v1608_v33 = vld [vmem:[#allocation3 + $0x8] sm:$0xff] }
 0x220   : > { %4271 = vmatprep.subr.bf16.mxu1 %v4715_v1 }
 0x223   : > { %4272 = vmatpush3.bf16.msra.mxu1 %v4481_v34  ;;  %v1607_v34 = vld [vmem:[#allocation3] sm:$0xff] }
 0x224   : > { %4273 = vmatprep.subr.bf16.mxu1 %v4715_v1 }
 0x227   : > { %4274 = vmatpush3.bf16.msra.mxu1 %v4483_v60  ;;  %v4529_v60 = vld [vmem:[%s5786_s11 + $0x50] sm:$0xff]  }
 0x228   : > { %4275 = vmatprep.subr.bf16.mxu1 %v4715_v1 }
 0x22b   : > { %4276 = vmatpush3.bf16.msra.mxu1 %v4485_v62  ;;  %v4530_v62 = vld [vmem:[%s5786_s11 + $0xd0] sm:$0xff]  }
 0x22c   : > { %4277 = vmatprep.subr.bf16.mxu1 %v4715_v1 }
 0x22f   : > { %4278 = vmatpush3.bf16.msra.mxu1 %v4487_v0  ;;  %v4532_v0 = vld [vmem:[%s5786_s11 + $0x90] sm:$0xff]  }
 0x230   : > { %4303 = vmatprep.subr.bf16.mxu1 %v4715_v1 }
 0x2d5   : > { %v1059_v35 = vpop.f32.mrb[8].mxu1 }
 0x2d6   : > { %v1126_v36 = vpop.f32.mrb[12].mxu0  ;;  %v4231_v38 = vpop.f32.mrb[9].mxu1 }
 0x2d7   : > { %v1127_v37 = vadd.f32 %v1126_v36, %v1059_v35  ;;  %v4243_v39 = vpop.f32.mrb[13].mxu0  ;;  %v1062_v40 = vpop.f32.mrb[10].mxu1  ;;  %v4506_v35 = vld [vmem:[%s5784_s9 + $0x80] sm:$0xff]   ;;  %v4509_v36 = vld [vmem:[%s5784_s9 + $0x50] sm:$0xff]   ;;  %v4508_v38 = vld [vmem:[%s5784_s9 + $0x88] sm:$0xff]  }
 0x2d8   : > { %v1129_v41 = vpop.f32.mrb[14].mxu0  ;;  %v4232_v42 = vpop.f32.mrb[11].mxu1  ;;  %v4511_v39 = vld [vmem:[%s5784_s9 + $0x58] sm:$0xff]   ;;  %v4510_v40 = vld [vmem:[%s5784_s9 + $0x90] sm:$0xff]  }
 0x2d9   : > { %v4244_v43 = vpop.f32.mrb[15].mxu0  ;;  %v4513_v41 = vld [vmem:[%s5784_s9 + $0x60] sm:$0xff]   ;;  %v4512_v42 = vld [vmem:[%s5784_s9 + $0x98] sm:$0xff]  }
 0x2da   : > { %v4515_v43 = vld [vmem:[%s5784_s9 + $0x68] sm:$0xff]  }
 0x2e5   : > { %v1204_v44 = vpop.f32.mrb[12].mxu1 }
 0x2e6   : > { %v1210_v46 = vadd.f32 %v1204_v44, %v1127_v37  ;;  %v4255_v47 = vpop.f32.mrb[13].mxu1  ;;  %v1625_v37 = vpack.c.bf16 %v1608_v33, %v1607_v34  ;;  %v4514_v44 = vld [vmem:[%s5784_s9 + $0xa0] sm:$0xff]  }
 0x2e7   : > { %v1207_v48 = vpop.f32.mrb[14].mxu1  ;;  %v4519_v47 = vld [vmem:[%s5784_s9 + $0x78] sm:$0xff]  }
 0x2e8   : > { %v1218_v49 = vadd.f32 %v3611_v45, %v1210_v46  ;;  %v4256_v50 = vpop.f32.mrb[15].mxu1  ;;  %v4517_v45 = vld [vmem:[%s5784_s9 + $0x70] sm:$0xff]   ;;  %v4516_v46 = vld [vmem:[%s5784_s9 + $0xa8] sm:$0xff]  }
 0x2e9   : > { %v4518_v48 = vld [vmem:[%s5784_s9 + $0xb0] sm:$0xff]   ;;  %v1828_v50 = vld [vmem:[#allocation3 + $0x2] sm:$0xff] }
 0x2ea   : > { %v1219_v51 = vmax.f32 %v1218_v49, 0.0  ;;  %v4520_v49 = vld [vmem:[%s5784_s9 + $0xb8] sm:$0xff]  }
 0x2ec   : > { %v1222_v52 = vpack.c.bf16 %v1219_v51, %v1219_v51  ;;  %v1829_v51 = vld [vmem:[#allocation3 + $0xa] sm:$0xff] }
 0x2ee   : > { %v1234_v53 = vsel %vm1232_vm3, %v1222_v52, 0  ;;  %v1847_v52 = vpack.c.bf16 %v1829_v51, %v1828_v50  ;;  %v1952_v50 = vlaneseq }
 0x2ef   : > { %4258 = vmatpush3.bf16.msra.mxu0 %v1234_v53  ;;  %v4521_v53 = vld [vmem:[%s5786_s11 + $0x40] sm:$0xff]  }
 0x2f0   : > { %4283 = vmatprep.subr.bf16.mxu0 %v4715_v1 }
 0x2f2   : > { %4260 = vmatmul.mubr.msk.bf16.vlgmr.msra.gmra.mrb[16].mxu0 %vm1228_vm4, %v4472_v54  ;;  %v4523_v54 = vld [vmem:[%s5786_s11] sm:$0xff]  }
 0x2f3   : > { %4284 = vmatpush3.bf16.msra.mxu0 %v4474_v55  ;;  %4299 = vmatprep.mubr.msk.bf16.mxu0 %vm4716_vm0, %v4715_v1  ;;  %v4524_v55 = vld [vmem:[%s5786_s11 + $0x80] sm:$0xff]  }
 0x2f4   : > { %4285 = vmatprep.subr.bf16.mxu0 %v4715_v1 }
 0x2f7   : > { %4286 = vmatpush3.bf16.msra.mxu0 %v4476_v56  ;;  %v4525_v56 = vld [vmem:[%s5786_s11 + $0x48] sm:$0xff]  }
 0x2f8   : > { %4287 = vmatprep.subr.bf16.mxu0 %v4715_v1 }
 0x2fb   : > { %4288 = vmatpush3.bf16.msra.mxu0 %v4478_v57  ;;  %v4526_v57 = vld [vmem:[%s5786_s11 + $0xc8] sm:$0xff]  }
 0x2fc   : > { %4289 = vmatprep.subr.bf16.mxu0 %v4715_v1 }
 0x2ff   : > { %4290 = vmatpush3.bf16.msra.mxu0 %v4480_v58  ;;  %v4527_v58 = vld [vmem:[%s5786_s11 + $0x8] sm:$0xff]  }
 0x300   : > { %4291 = vmatprep.subr.bf16.mxu0 %v4715_v1 }
 0x303   : > { %4292 = vmatpush3.bf16.msra.mxu0 %v4482_v59  ;;  %v4528_v59 = vld [vmem:[%s5786_s11 + $0x88] sm:$0xff]  }
 0x304   : > { %4293 = vmatprep.subr.bf16.mxu0 %v4715_v1 }
 0x307   : > { %4294 = vmatpush3.bf16.msra.mxu0 %v4484_v63  ;;  %v4531_v63 = vld [vmem:[%s5786_s11 + $0x10] sm:$0xff]  }
 0x308   : > { %4295 = vmatprep.subr.bf16.mxu0 %v4715_v1 }
 0x30b   : > { %4296 = vmatpush3.bf16.msra.mxu0 %v4486_v2  ;;  %v4533_v2 = vld [vmem:[%s5786_s11 + $0x58] sm:$0xff]  }
 0x30c   : > { %4297 = vmatprep.subr.bf16.mxu0 %v4715_v1 }
 0x30f   : > { %4298 = vmatpush3.bf16.msra.mxu0 %v4488_v3  ;;  %v4534_v3 = vld [vmem:[%s5786_s11 + $0xd8] sm:$0xff]  }
 0x310   : > { %4323 = vmatprep.subr.bf16.mxu0 %v4715_v1 }
 0x3c5   : > { %v1270_v4 = vpop.f32.mrb[16].mxu0 }
 0x3c6   : > { %1277 = vst [vmem:[#allocation5 + $0x1] sm:$0xff] %v1270_v4  ;;  %v4261_v5 = vpop.f32.mrb[17].mxu0 }
 0x3c7   : > { %v1273_v6 = vpop.f32.mrb[18].mxu0  ;;  %v4536_v5 = vld [vmem:[%s5786_s11 + $0x98] sm:$0xff]  }
 0x3c8   : > { %1278 = vst [vmem:[#allocation5 + $0x9] sm:$0xff] %v1273_v6  ;;  %v4262_v8 = vpop.f32.mrb[19].mxu0  ;;  %v1317_v9 = vpack.c.bf16 %v1273_v6, %v1270_v4  ;;  %v4535_v4 = vld [vmem:[%s5786_s11 + $0x18] sm:$0xff]   ;;  %v4537_v6 = vld [vmem:[%s5786_s11 + $0x60] sm:$0xff]  }
 0x3c9   : > { %v4539_v8 = vld [vmem:[%s5786_s11 + $0x20] sm:$0xff]  }
 0x3ca   : > { %4280 = vmatmul.mubr.bf16.vlgmr.msra.gmra.mrb[16].mxu1 %v1317_v9  ;;  %v4540_v9 = vld [vmem:[%s5786_s11 + $0xa0] sm:$0xff]  }
 0x3cb   : > { %4304 = vmatpush3.bf16.msra.mxu1 %v4489_v7  ;;  %4319 = vmatprep.mubr.msk.bf16.mxu1 %vm4716_vm0, %v4715_v1  ;;  %v4538_v7 = vld [vmem:[%s5786_s11 + $0xe0] sm:$0xff]  }
 0x3cc   : > { %4305 = vmatprep.subr.bf16.mxu1 %v4715_v1 }
 0x3cd   : > { %v1279_v12 = vld [vmem:[#allocation5] sm:$0xff] }
 0x3cf   : > { %v1280_v13 = vld [vmem:[#allocation5 + $0x8] sm:$0xff]  ;;  %4306 = vmatpush3.bf16.msra.mxu1 %v4491_v10 }
 0x3d0   : > { %v1297_v15 = vpack.c.bf16 %v1280_v13, %v1279_v12  ;;  %4307 = vmatprep.subr.bf16.mxu1 %v4715_v1  ;;  %v1496_v26 = vld [vmem:[#allocation5 + $0x2] sm:$0xff]  ;;  %v1497_v27 = vld [vmem:[#allocation5 + $0xa] sm:$0xff] }
 0x3d1   : > { %v1515_v30 = vpack.c.bf16 %v1497_v27, %v1496_v26  ;;  %v4541_v10 = vld [vmem:[%s5786_s11 + $0x68] sm:$0xff]  }
 0x3d2   : > { %4300 = vmatmul.mubr.bf16.vlgmr.msra.gmra.mrb[20].mxu0 %v1297_v15  ;;  %v4543_v12 = vld [vmem:[%s5786_s11 + $0x28] sm:$0xff]   ;;  %v4546_v15 = vld [vmem:[%s5786_s11 + $0xf0] sm:$0xff]  }
 0x3d3   : > { %4324 = vmatpush3.bf16.msra.mxu0 %v4490_v11  ;;  %4308 = vmatpush3.bf16.msra.mxu1 %v4493_v14  ;;  %v4542_v11 = vld [vmem:[%s5786_s11 + $0xe8] sm:$0xff]   ;;  %v4545_v14 = vld [vmem:[%s5786_s11 + $0x70] sm:$0xff]  }
 0x3d4   : > { %4325 = vmatprep.subr.bf16.mxu0 %v4715_v1  ;;  %4309 = vmatprep.subr.bf16.mxu1 %v4715_v1  ;;  %v4544_v13 = vld [vmem:[%s5786_s11 + $0xa8] sm:$0xff]  }
 0x3d5   : > { %4339 = vmatprep.mubr.msk.bf16.mxu0 %vm4716_vm0, %v4715_v1 }
 0x3d7   : > { %4326 = vmatpush3.bf16.msra.mxu0 %v4492_v16  ;;  %4310 = vmatpush3.bf16.msra.mxu1 %v4495_v17  ;;  %v4547_v16 = vld [vmem:[%s5786_s11 + $0x30] sm:$0xff]  }
 0x3d8   : > { %4327 = vmatprep.subr.bf16.mxu0 %v4715_v1  ;;  %4311 = vmatprep.subr.bf16.mxu1 %v4715_v1  ;;  %v4548_v17 = vld [vmem:[%s5786_s11 + $0xb0] sm:$0xff]  }
 0x3db   : > { %4328 = vmatpush3.bf16.msra.mxu0 %v4494_v18  ;;  %4312 = vmatpush3.bf16.msra.mxu1 %v4497_v19  ;;  %v4549_v18 = vld [vmem:[%s5786_s11 + $0x78] sm:$0xff]  }
 0x3dc   : > { %4329 = vmatprep.subr.bf16.mxu0 %v4715_v1  ;;  %4313 = vmatprep.subr.bf16.mxu1 %v4715_v1  ;;  %v4550_v19 = vld [vmem:[%s5786_s11 + $0xf8] sm:$0xff]  }
 0x3df   : > { %4330 = vmatpush3.bf16.msra.mxu0 %v4496_v20  ;;  %4314 = vmatpush3.bf16.msra.mxu1 %v4499_v21  ;;  %v4551_v20 = vld [vmem:[%s5786_s11 + $0x38] sm:$0xff]  }
 0x3e0   : > { %4331 = vmatprep.subr.bf16.mxu0 %v4715_v1  ;;  %4315 = vmatprep.subr.bf16.mxu1 %v4715_v1  ;;  %v4552_v21 = vld [vmem:[%s5786_s11 + $0xb8] sm:$0xff]  }
 0x3e3   : > { %4332 = vmatpush3.bf16.msra.mxu0 %v4498_v22  ;;  %4316 = vmatpush3.bf16.msra.mxu1 %v4501_v23  ;;  %v4553_v22 = vld [vmem:[%s5786_s11 + $0x140] sm:$0xff]  }
 0x3e4   : > { %4333 = vmatprep.subr.bf16.mxu0 %v4715_v1  ;;  %4317 = vmatprep.subr.bf16.mxu1 %v4715_v1  ;;  %v4554_v23 = vld [vmem:[%s5786_s11 + $0x1c0] sm:$0xff]  }
 0x3e7   : > { %4334 = vmatpush3.bf16.msra.mxu0 %v4500_v24  ;;  %4318 = vmatpush3.bf16.msra.mxu1 %v4503_v25 }
 0x3e8   : > { %4335 = vmatprep.subr.bf16.mxu0 %v4715_v1  ;;  %4343 = vmatprep.subr.bf16.mxu1 %v4715_v1 }
 0x3ea   : > { %4320 = vmatmul.mubr.bf16.vlgmr.msra.gmra.mrb[20].mxu1 %v1515_v30 }
 0x3eb   : > { %4336 = vmatpush3.bf16.msra.mxu0 %v4502_v28  ;;  %4344 = vmatpush3.bf16.msra.mxu1 %v4505_v29 }
 0x3ec   : > { %4337 = vmatprep.subr.bf16.mxu0 %v4715_v1  ;;  %4345 = vmatprep.subr.bf16.mxu1 %v4715_v1 }
 0x3ed   : > { %4359 = vmatprep.mubr.msk.bf16.mxu1 %vm4716_vm0, %v4715_v1 }
 0x3ef   : > { %4338 = vmatpush3.bf16.msra.mxu0 %v4504_v31  ;;  %4346 = vmatpush3.bf16.msra.mxu1 %v4507_v32 }
 0x3f0   : > { %4363 = vmatprep.subr.bf16.mxu0 %v4715_v1  ;;  %4347 = vmatprep.subr.bf16.mxu1 %v4715_v1 }
 0x3f2   : > { %4340 = vmatmul.mubr.bf16.vlgmr.msra.gmra.mrb[24].mxu0 %v1625_v37 }
 0x3f3   : > { %4364 = vmatpush3.bf16.msra.mxu0 %v4506_v35  ;;  %4348 = vmatpush3.bf16.msra.mxu1 %v4509_v36 }
 0x3f4   : > { %4365 = vmatprep.subr.bf16.mxu0 %v4715_v1  ;;  %4349 = vmatprep.subr.bf16.mxu1 %v4715_v1 }
 0x3f5   : > { %4379 = vmatprep.mubr.msk.bf16.mxu0 %vm4716_vm0, %v4715_v1 }
 0x3f7   : > { %4366 = vmatpush3.bf16.msra.mxu0 %v4508_v38  ;;  %4350 = vmatpush3.bf16.msra.mxu1 %v4511_v39 }
 0x3f8   : > { %4367 = vmatprep.subr.bf16.mxu0 %v4715_v1  ;;  %4351 = vmatprep.subr.bf16.mxu1 %v4715_v1 }
 0x3fb   : > { %4368 = vmatpush3.bf16.msra.mxu0 %v4510_v40  ;;  %4352 = vmatpush3.bf16.msra.mxu1 %v4513_v41 }
 0x3fc   : > { %4369 = vmatprep.subr.bf16.mxu0 %v4715_v1  ;;  %4353 = vmatprep.subr.bf16.mxu1 %v4715_v1 }
 0x3ff   : > { %4370 = vmatpush3.bf16.msra.mxu0 %v4512_v42  ;;  %4354 = vmatpush3.bf16.msra.mxu1 %v4515_v43 }
 0x400   : > { %4371 = vmatprep.subr.bf16.mxu0 %v4715_v1  ;;  %4355 = vmatprep.subr.bf16.mxu1 %v4715_v1 }
 0x403   : > { %4372 = vmatpush3.bf16.msra.mxu0 %v4514_v44  ;;  %4356 = vmatpush3.bf16.msra.mxu1 %v4517_v45 }
 0x404   : > { %4373 = vmatprep.subr.bf16.mxu0 %v4715_v1  ;;  %4357 = vmatprep.subr.bf16.mxu1 %v4715_v1 }
 0x407   : > { %4374 = vmatpush3.bf16.msra.mxu0 %v4516_v46  ;;  %4358 = vmatpush3.bf16.msra.mxu1 %v4519_v47 }
 0x408   : > { %4375 = vmatprep.subr.bf16.mxu0 %v4715_v1  ;;  %3966 = vmatprep.subr.bf16.mxu1 %v4521_v53  ;;  %v5365_v53 = vshrl.u32 %v1952_v50, 7  ;;  %v4577_v50 = vld [vmem:[%s5786_s11 + $0x170] sm:$0xff]  }
 0x40a   : > { %4360 = vmatmul.mubr.bf16.vlgmr.msra.gmra.mrb[24].mxu1 %v4991_v61  ;;  %v4522_v61 = vld [vmem:[%s5786_s11 + $0xc0] sm:$0xff]  }
 0x40b   : > { %4376 = vmatpush3.bf16.msra.mxu0 %v4518_v48  ;;  %3967 = vmatpush3.bf16.msra.mxu1 %v4523_v54  ;;  %v3726_v54 = vld [vmem:[%s5785_s10] ss:$0 sm:$0xff] }
 0x40c   : > { %4377 = vmatprep.subr.bf16.mxu0 %v4715_v1  ;;  %3968 = vmatprep.subr.bf16.mxu1 %v4525_v56 }
 0x40f   : > { %4378 = vmatpush3.bf16.msra.mxu0 %v4520_v49  ;;  %3969 = vmatpush3.bf16.msra.mxu1 %v4527_v58  ;;  %v1958_v58 = vsub.s32 1, %v5365_v53 }
 0x410   : > { %3988 = vmatprep.subr.bf16.mxu0 %v4522_v61  ;;  %3970 = vmatprep.subr.bf16.mxu1 %v4529_v60 }
 0x412   : > { %4380 = vmatmul.mubr.bf16.vlgmr.msra.gmra.mrb[28].mxu0 %v1847_v52 }
 0x413   : > { %3989 = vmatpush3.bf16.msra.mxu0 %v4524_v55  ;;  %3971 = vmatpush3.bf16.msra.mxu1 %v4531_v63  ;;  %v1966_v63 = vsub.s32 3, %v5365_v53 }
 0x414   : > { %3990 = vmatprep.subr.bf16.mxu0 %v4526_v57  ;;  %3972 = vmatprep.subr.bf16.mxu1 %v4533_v2  ;;  %v1962_v2 = vsub.s32 2, %v5365_v53 }
 0x417   : > { %3991 = vmatpush3.bf16.msra.mxu0 %v4528_v59  ;;  %3973 = vmatpush3.bf16.msra.mxu1 %v4535_v4  ;;  %v1982_v4 = vsub.s32 7, %v5365_v53 }
 0x418   : > { %3992 = vmatprep.subr.bf16.mxu0 %v4530_v62  ;;  %3974 = vmatprep.subr.bf16.mxu1 %v4537_v6 }
 0x41b   : > { %3993 = vmatpush3.bf16.msra.mxu0 %v4532_v0  ;;  %3975 = vmatpush3.bf16.msra.mxu1 %v4539_v8  ;;  %v1954_v0 = vsub.s32 0, %v5365_v53 }
 0x41c   : > { %3994 = vmatprep.subr.bf16.mxu0 %v4534_v3  ;;  %3976 = vmatprep.subr.bf16.mxu1 %v4541_v10  ;;  %v1974_v3 = vsub.s32 5, %v5365_v53 }
 0x41f   : > { %3995 = vmatpush3.bf16.msra.mxu0 %v4536_v5  ;;  %3977 = vmatpush3.bf16.msra.mxu1 %v4543_v12 }
 0x420   : > { %3996 = vmatprep.subr.bf16.mxu0 %v4538_v7  ;;  %3978 = vmatprep.subr.bf16.mxu1 %v4545_v14 }
 0x423   : > { %3997 = vmatpush3.bf16.msra.mxu0 %v4540_v9  ;;  %3979 = vmatpush3.bf16.msra.mxu1 %v4547_v16 }
 0x424   : > { %3998 = vmatprep.subr.bf16.mxu0 %v4542_v11  ;;  %3980 = vmatprep.subr.bf16.mxu1 %v4549_v18  ;;  %v4556_v18 = vld [vmem:[%s5786_s11 + $0x180] sm:$0xff]  }
 0x427   : > { %3999 = vmatpush3.bf16.msra.mxu0 %v4544_v13  ;;  %3981 = vmatpush3.bf16.msra.mxu1 %v4551_v20 }
 0x428   : > { %4000 = vmatprep.subr.bf16.mxu0 %v4546_v15  ;;  %4010 = vmatprep.subr.bf16.mxu1 %v4553_v22  ;;  %v4557_v22 = vld [vmem:[%s5786_s11 + $0x148] sm:$0xff]  }
 0x42b   : > { %4001 = vmatpush3.bf16.msra.mxu0 %v4548_v17  ;;  %v4555_v17 = vld [vmem:[%s5786_s11 + $0x100] sm:$0xff]  }
 0x42c   : > { %4002 = vmatprep.subr.bf16.mxu0 %v4550_v19 }
 0x42f   : > { %4003 = vmatpush3.bf16.msra.mxu0 %v4552_v21 }
 0x430   : > { %4032 = vmatprep.subr.bf16.mxu0 %v4554_v23  ;;  %v4558_v23 = vld [vmem:[%s5786_s11 + $0x1c8] sm:$0xff]  }
 0x49d   : > { %v1400_v24 = vpop.f32.mrb[16].mxu1 }
 0x49e   : > { %v4281_v25 = vpop.f32.mrb[17].mxu1 }
 0x49f   : > { %v1403_v26 = vpop.f32.mrb[18].mxu1 }
 0x4a0   : > { %v4282_v27 = vpop.f32.mrb[19].mxu1 }
 0x4a1   : > { %v4559_v27 = vld [vmem:[%s5786_s11 + $0x108] sm:$0xff]  }
 0x4a5   : > { %v1489_v28 = vpop.f32.mrb[20].mxu0 }
 0x4a6   : > { %v1490_v29 = vadd.f32 %v1489_v28, %v1400_v24  ;;  %v4301_v30 = vpop.f32.mrb[21].mxu0  ;;  %v4560_v28 = vld [vmem:[%s5786_s11 + $0x188] sm:$0xff]  }
 0x4a7   : > { %v1492_v31 = vpop.f32.mrb[22].mxu0  ;;  %v1978_v30 = vsub.s32 6, %v5365_v53 }
 0x4a8   : > { %v1493_v32 = vadd.f32 %v1492_v31, %v1403_v26  ;;  %v4302_v33 = vpop.f32.mrb[23].mxu0 }
 0x4a9   : > { %v4562_v33 = vld [vmem:[%s5786_s11 + $0x1d0] sm:$0xff]  }
 0x4bd   : > { %v1598_v34 = vpop.f32.mrb[20].mxu1 }
 0x4be   : > { %v1605_v35 = vadd.f32 %v1598_v34, %v1490_v29  ;;  %v4321_v36 = vpop.f32.mrb[21].mxu1  ;;  %v1970_v29 = vsub.s32 4, %v5365_v53  ;;  %v4589_v53 = vld [vmem:[%s5786_s11 + $0x248] sm:$0xff]  }
 0x4bf   : > { %v1601_v37 = vpop.f32.mrb[22].mxu1  ;;  %v4563_v36 = vld [vmem:[%s5786_s11 + $0x110] sm:$0xff]  }
 0x4c0   : > { %v1606_v38 = vadd.f32 %v1601_v37, %v1493_v32  ;;  %v4322_v39 = vpop.f32.mrb[23].mxu1  ;;  %v4561_v32 = vld [vmem:[%s5786_s11 + $0x150] sm:$0xff]  }
 0x4c1   : > { %v4564_v37 = vld [vmem:[%s5786_s11 + $0x190] sm:$0xff]   ;;  %v4566_v39 = vld [vmem:[%s5786_s11 + $0x1d8] sm:$0xff]  }
 0x4c5   : > { %v1708_v40 = vpop.f32.mrb[24].mxu0 }
 0x4c6   : > { %v1715_v41 = vadd.f32 %v1708_v40, %v1605_v35  ;;  %v4341_v42 = vpop.f32.mrb[25].mxu0  ;;  %v4567_v40 = vld [vmem:[%s5786_s11 + $0x118] sm:$0xff]  }
 0x4c7   : > { %v1711_v43 = vpop.f32.mrb[26].mxu0  ;;  %v4569_v42 = vld [vmem:[%s5786_s11 + $0x160] sm:$0xff]  }
 0x4c8   : > { %v1716_v44 = vadd.f32 %v1711_v43, %v1606_v38  ;;  %v4342_v45 = vpop.f32.mrb[27].mxu0  ;;  %v4565_v38 = vld [vmem:[%s5786_s11 + $0x158] sm:$0xff]   ;;  %v4570_v43 = vld [vmem:[%s5786_s11 + $0x1e0] sm:$0xff]  }
 0x4c9   : > { %v4572_v45 = vld [vmem:[%s5786_s11 + $0x1a0] sm:$0xff]  }
 0x4dd   : > { %v1819_v46 = vpop.f32.mrb[24].mxu1 }
 0x4de   : > { %v1826_v47 = vadd.f32 %v1819_v46, %v1715_v41  ;;  %v4361_v48 = vpop.f32.mrb[25].mxu1  ;;  %v4568_v41 = vld [vmem:[%s5786_s11 + $0x198] sm:$0xff]   ;;  %v4573_v46 = vld [vmem:[%s5786_s11 + $0x168] sm:$0xff]  }
 0x4df   : > { %v1822_v49 = vpop.f32.mrb[26].mxu1  ;;  %v4575_v48 = vld [vmem:[%s5786_s11 + $0x128] sm:$0xff]  }
 0x4e0   : > { %v1827_v51 = vadd.f32 %v1822_v49, %v1716_v44  ;;  %v4362_v52 = vpop.f32.mrb[27].mxu1  ;;  %v4571_v44 = vld [vmem:[%s5786_s11 + $0x120] sm:$0xff]   ;;  %v4576_v49 = vld [vmem:[%s5786_s11 + $0x1a8] sm:$0xff]  }
 0x4e1   : > { %v4579_v52 = vld [vmem:[%s5786_s11 + $0x130] sm:$0xff]  }
 0x4e5   : > { %v1930_v61 = vpop.f32.mrb[28].mxu0 }
 0x4e6   : > { %v1937_v55 = vadd.f32 %v1930_v61, %v1826_v47  ;;  %v4381_v56 = vpop.f32.mrb[29].mxu0  ;;  %v4574_v47 = vld [vmem:[%s5786_s11 + $0x1e8] sm:$0xff]   ;;  %v4580_v61 = vld [vmem:[%s5786_s11 + $0x1b0] sm:$0xff]  }
 0x4e7   : > { %v1933_v57 = vpop.f32.mrb[30].mxu0  ;;  %v4583_v56 = vld [vmem:[%s5786_s11 + $0x138] sm:$0xff]  }
 0x4e8   : > { %v1946_v59 = vadd.f32 %v3726_v54, %v1937_v55  ;;  %v1938_v60 = vadd.f32 %v1933_v57, %v1827_v51  ;;  %v4382_v62 = vpop.f32.mrb[31].mxu0  ;;  %v4578_v51 = vld [vmem:[%s5786_s11 + $0x1f0] sm:$0xff]   ;;  %v4582_v55 = vld [vmem:[%s5786_s11 + $0x1f8] sm:$0xff]  }
 0x4e9   : > { %v4584_v57 = vld [vmem:[%s5786_s11 + $0x1b8] sm:$0xff]   ;;  %v4585_v62 = vld [vmem:[%s5786_s11 + $0x240] sm:$0xff]  }
 0x4ea   : > { %v5376_v5 = vmax.f32 %v1946_v59, 0.0  ;;  %v1947_v6 = vadd.f32 %v3726_v54, %v1938_v60  ;;  %v4581_v54 = vld [vmem:[%s5786_s11 + $0x178] sm:$0xff]  }
 0x4ec   : > { %v1959_v7 = vrot.slane %v5376_v5, %v1958_v58  ;;  %v1967_v8 = vrot.slane %v5376_v5, %v1966_v63  ;;  %v1955_v9 = vrot.slane %v5376_v5, %v1954_v0  ;;  %v5385_v10 = vmax.f32 %v1947_v6, 0.0 }
 0x4ed   : > { %v1963_v11 = vrot.slane %v5376_v5, %v1962_v2  ;;  %v1975_v12 = vrot.slane %v5376_v5, %v1974_v3  ;;  %v1983_v13 = vrot.slane %v5376_v5, %v1982_v4  ;;  %v1971_v59 = vrot.slane %v5376_v5, %v1970_v29 }
 0x4ee   : > { %v2033_v14 = vpack.c.bf16 %v1959_v7, %v1959_v7  ;;  %v2035_v15 = vpack.c.bf16 %v1967_v8, %v1967_v8  ;;  %v2032_v16 = vpack.c.bf16 %v1955_v9, %v1955_v9  ;;  %v5403_v24 = vrot.slane %v5385_v10, %v1954_v0  ;;  %v4586_v0 = vld [vmem:[%s5786_s11 + $0x2c0] sm:$0xff]   ;;  %v4591_v9 = vld [vmem:[%s5786_s11 + $0x208] sm:$0xff]  }
 0x4ef   : > { %v2034_v19 = vpack.c.bf16 %v1963_v11, %v1963_v11  ;;  %v2037_v20 = vpack.c.bf16 %v1975_v12, %v1975_v12  ;;  %v2039_v21 = vpack.c.bf16 %v1983_v13, %v1983_v13  ;;  %v5406_v25 = vrot.slane %v5385_v10, %v1962_v2  ;;  %v4588_v7 = vld [vmem:[%s5786_s11 + $0x280] sm:$0xff]   ;;  %v4593_v11 = vld [vmem:[%s5786_s11 + $0x250] sm:$0xff]  }
 0x4f0   : > { %3105 = vmatprep.mubr.bf16.mxu1 %v2033_v14  ;;  %3145 = vmatprep.mubr.bf16.mxu0 %v2035_v15  ;;  %v5409_v26 = vrot.slane %v5385_v10, %v1974_v3  ;;  %v5420_v31 = vrot.slane %v5385_v10, %v1982_v4  ;;  %v5429_v34 = vrot.slane %v5385_v10, %v1970_v29  ;;  %v4587_v4 = vld [vmem:[%s5786_s11 + $0x200] sm:$0xff]   ;;  %v4594_v12 = vld [vmem:[%s5786_s11 + $0x2d0] sm:$0xff]   ;;  %v4597_v15 = vld [vmem:[%s5786_s11 + $0x258] sm:$0xff]  }
 0x4f1   : > { %3106 = vmatmul.mubr.bf16.vlgmr.msra.gmra.mrb[28].mxu1 %v2032_v16  ;;  %3146 = vmatmul.mubr.bf16.vlgmr.msra.gmra.mrb[32].mxu0 %v2034_v19  ;;  %v5432_v35 = vrot.slane %v5385_v10, %v1978_v30  ;;  %v1979_v60 = vrot.slane %v5376_v5, %v1978_v30  ;;  %v1991_v2 = vrot.slane %v5385_v10, %v1958_v58  ;;  %v4590_v58 = vld [vmem:[%s5786_s11 + $0x2c8] sm:$0xff]   ;;  %v4595_v13 = vld [vmem:[%s5786_s11 + $0x210] sm:$0xff]   ;;  %v4598_v16 = vld [vmem:[%s5786_s11 + $0x2d8] sm:$0xff]  }
 0x4f2   : > { %4011 = vmatpush3.bf16.msra.mxu1 %v4555_v17  ;;  %4033 = vmatpush3.bf16.msra.mxu0 %v4556_v18  ;;  %v1999_v3 = vrot.slane %v5385_v10, %v1966_v63  ;;  %v2036_v5 = vpack.c.bf16 %v1971_v59, %v1971_v59  ;;  %v4592_v10 = vld [vmem:[%s5786_s11 + $0x288] sm:$0xff]   ;;  %v4596_v14 = vld [vmem:[%s5786_s11 + $0x290] sm:$0xff]   ;;  %v4599_v17 = vld [vmem:[%s5786_s11 + $0x218] sm:$0xff]  }
 0x4f3   : > { %3185 = vmatprep.mubr.bf16.mxu1 %v2037_v20  ;;  %3225 = vmatprep.mubr.bf16.mxu0 %v2039_v21  ;;  %v2038_v6 = vpack.c.bf16 %v1979_v60, %v1979_v60  ;;  %v2041_v8 = vpack.c.bf16 %v1991_v2, %v1991_v2  ;;  %v4600_v18 = vld [vmem:[%s5786_s11 + $0x298] sm:$0xff]   ;;  %v4601_v19 = vld [vmem:[%s5786_s11 + $0x260] sm:$0xff]   ;;  %v4608_v29 = vld [vmem:[%s5786_s11 + $0x2a8] sm:$0xff]  }
 0x4f4   : > { %4012 = vmatprep.subr.bf16.mxu1 %v4557_v22  ;;  %4034 = vmatprep.subr.bf16.mxu0 %v4558_v23  ;;  %v2043_v63 = vpack.c.bf16 %v1999_v3, %v1999_v3  ;;  %v4602_v20 = vld [vmem:[%s5786_s11 + $0x2e0] sm:$0xff]   ;;  %v4605_v23 = vld [vmem:[%s5786_s11 + $0x268] sm:$0xff]   ;;  %v4609_v30 = vld [vmem:[%s5786_s11 + $0x270] sm:$0xff]  }
 0x4f5   : > { %v4603_v21 = vld [vmem:[%s5786_s11 + $0x220] sm:$0xff]   ;;  %v4638_v2 = vld [vmem:[%s5786_s11 + $0x3e8] sm:$0xff]  }
 0x4f6   : > { %4013 = vmatpush3.bf16.msra.mxu1 %v4559_v27  ;;  %4035 = vmatpush3.bf16.msra.mxu0 %v4560_v28  ;;  %v4604_v22 = vld [vmem:[%s5786_s11 + $0x2a0] sm:$0xff]   ;;  %v4606_v27 = vld [vmem:[%s5786_s11 + $0x2e8] sm:$0xff]  }
 0x4f7   : > { %4014 = vmatprep.subr.bf16.mxu1 %v4561_v32  ;;  %4036 = vmatprep.subr.bf16.mxu0 %v4562_v33  ;;  %v4607_v28 = vld [vmem:[%s5786_s11 + $0x228] sm:$0xff]   ;;  %v4610_v32 = vld [vmem:[%s5786_s11 + $0x2f0] sm:$0xff]   ;;  %v4634_v59 = vld [vmem:[%s5786_s11 + $0x3e0] sm:$0xff]  }
 0x4f8   : > { %v4611_v33 = vld [vmem:[%s5786_s11 + $0x230] sm:$0xff]   ;;  %v4635_v60 = vld [vmem:[%s5786_s11 + $0x320] sm:$0xff]   ;;  %v4639_v3 = vld [vmem:[%s5786_s11 + $0x328] sm:$0xff]  }
 0x4fa   : > { %4015 = vmatpush3.bf16.msra.mxu1 %v4563_v36  ;;  %4037 = vmatpush3.bf16.msra.mxu0 %v4564_v37  ;;  %v4612_v36 = vld [vmem:[%s5786_s11 + $0x2b0] sm:$0xff]   ;;  %v4613_v37 = vld [vmem:[%s5786_s11 + $0x278] sm:$0xff]  }
 0x4fb   : > { %4016 = vmatprep.subr.bf16.mxu1 %v4565_v38  ;;  %4038 = vmatprep.subr.bf16.mxu0 %v4566_v39  ;;  %v4614_v38 = vld [vmem:[%s5786_s11 + $0x2f8] sm:$0xff]  }
 0x4fc   : > { %v4615_v39 = vld [vmem:[%s5786_s11 + $0x238] sm:$0xff]  }
 0x4fe   : > { %4017 = vmatpush3.bf16.msra.mxu1 %v4567_v40  ;;  %4039 = vmatpush3.bf16.msra.mxu0 %v4568_v41  ;;  %v4616_v40 = vld [vmem:[%s5786_s11 + $0x2b8] sm:$0xff]   ;;  %v4617_v41 = vld [vmem:[%s5786_s11 + $0x340] sm:$0xff]  }
 0x4ff   : > { %4018 = vmatprep.subr.bf16.mxu1 %v4569_v42  ;;  %4040 = vmatprep.subr.bf16.mxu0 %v4570_v43  ;;  %v4618_v42 = vld [vmem:[%s5786_s11 + $0x3c0] sm:$0xff]  }
 0x500   : > { %v4619_v43 = vld [vmem:[%s5786_s11 + $0x300] sm:$0xff]  }
 0x502   : > { %4019 = vmatpush3.bf16.msra.mxu1 %v4571_v44  ;;  %4041 = vmatpush3.bf16.msra.mxu0 %v4572_v45  ;;  %v2040_v44 = vpack.c.bf16 %v5403_v24, %v5403_v24  ;;  %v4620_v45 = vld [vmem:[%s5786_s11 + $0x380] sm:$0xff]   ;;  %v4622_v24 = vld [vmem:[%s5786_s11 + $0x3c8] sm:$0xff]  }
 0x503   : > { %4020 = vmatprep.subr.bf16.mxu1 %v4573_v46  ;;  %4042 = vmatprep.subr.bf16.mxu0 %v4574_v47  ;;  %v2042_v46 = vpack.c.bf16 %v5406_v25, %v5406_v25  ;;  %v4621_v47 = vld [vmem:[%s5786_s11 + $0x348] sm:$0xff]  }
 0x504   : > { %v4623_v25 = vld [vmem:[%s5786_s11 + $0x308] sm:$0xff]  }
 0x506   : > { %4021 = vmatpush3.bf16.msra.mxu1 %v4575_v48  ;;  %4043 = vmatpush3.bf16.msra.mxu0 %v4576_v49  ;;  %v2045_v48 = vpack.c.bf16 %v5409_v26, %v5409_v26  ;;  %v2047_v49 = vpack.c.bf16 %v5420_v31, %v5420_v31  ;;  %v4625_v26 = vld [vmem:[%s5786_s11 + $0x350] sm:$0xff]  }
 0x507   : > { %4022 = vmatprep.subr.bf16.mxu1 %v4577_v50  ;;  %4044 = vmatprep.subr.bf16.mxu0 %v4578_v51  ;;  %v4624_v50 = vld [vmem:[%s5786_s11 + $0x388] sm:$0xff]   ;;  %v4626_v31 = vld [vmem:[%s5786_s11 + $0x3d0] sm:$0xff]  }
 0x508   : > { %v4627_v51 = vld [vmem:[%s5786_s11 + $0x310] sm:$0xff]  }
 0x50a   : > { %4023 = vmatpush3.bf16.msra.mxu1 %v4579_v52  ;;  %4045 = vmatpush3.bf16.msra.mxu0 %v4580_v61  ;;  %v4628_v52 = vld [vmem:[%s5786_s11 + $0x390] sm:$0xff]   ;;  %v4629_v61 = vld [vmem:[%s5786_s11 + $0x358] sm:$0xff]  }
 0x50b   : > { %4024 = vmatprep.subr.bf16.mxu1 %v4581_v54  ;;  %4046 = vmatprep.subr.bf16.mxu0 %v4582_v55  ;;  %v4630_v54 = vld [vmem:[%s5786_s11 + $0x3d8] sm:$0xff]  }
 0x50c   : > { %v4631_v55 = vld [vmem:[%s5786_s11 + $0x318] sm:$0xff]  }
 0x50e   : > { %4025 = vmatpush3.bf16.msra.mxu1 %v4583_v56  ;;  %4047 = vmatpush3.bf16.msra.mxu0 %v4584_v57  ;;  %v4632_v56 = vld [vmem:[%s5786_s11 + $0x398] sm:$0xff]   ;;  %v4633_v57 = vld [vmem:[%s5786_s11 + $0x360] sm:$0xff]  }
 0x50f   : > { %4054 = vmatprep.subr.bf16.mxu1 %v4585_v62  ;;  %4076 = vmatprep.subr.bf16.mxu0 %v4586_v0  ;;  %v4636_v62 = vld [vmem:[%s5786_s11 + $0x3a0] sm:$0xff]   ;;  %v4637_v0 = vld [vmem:[%s5786_s11 + $0x368] sm:$0xff]  }
 0x511   : > { %3186 = vmatmul.mubr.bf16.vlgmr.msra.gmra.mrb[32].mxu1 %v2036_v5  ;;  %3226 = vmatmul.mubr.bf16.vlgmr.msra.gmra.mrb[36].mxu0 %v2038_v6  ;;  %v4641_v5 = vld [vmem:[%s5786_s11 + $0x370] sm:$0xff]  }
 0x512   : > { %4055 = vmatpush3.bf16.msra.mxu1 %v4587_v4  ;;  %3265 = vmatprep.mubr.bf16.mxu1 %v2041_v8  ;;  %v4640_v4 = vld [vmem:[%s5786_s11 + $0x3a8] sm:$0xff]   ;;  %v4642_v6 = vld [vmem:[%s5786_s11 + $0x3f0] sm:$0xff]  }
 0x513   : > { %4077 = vmatpush3.bf16.msra.mxu0 %v4588_v7  ;;  %3305 = vmatprep.mubr.bf16.mxu0 %v2043_v63  ;;  %v4643_v7 = vld [vmem:[%s5786_s11 + $0x330] sm:$0xff]   ;;  %v4647_v63 = vld [vmem:[%s5786_s11 + $0x338] sm:$0xff]  }
 0x514   : > { %4056 = vmatprep.subr.bf16.mxu1 %v4589_v53  ;;  %4078 = vmatprep.subr.bf16.mxu0 %v4590_v58  ;;  %v4644_v8 = vld [vmem:[%s5786_s11 + $0x3b0] sm:$0xff]   ;;  %v4645_v53 = vld [vmem:[%s5786_s11 + $0x378] sm:$0xff]  }
 0x515   : > { %v4646_v58 = vld [vmem:[%s5786_s11 + $0x3f8] sm:$0xff]  }
 0x516   : > { %4057 = vmatpush3.bf16.msra.mxu1 %v4591_v9  ;;  %v4648_v9 = vld [vmem:[%s5786_s11 + $0x3b8] sm:$0xff]  }
 0x517   : > { %4079 = vmatpush3.bf16.msra.mxu0 %v4592_v10  ;;  %4058 = vmatprep.subr.bf16.mxu1 %v4593_v11  ;;  %v2044_v10 = vpack.c.bf16 %v5429_v34, %v5429_v34  ;;  %v2046_v11 = vpack.c.bf16 %v5432_v35, %v5432_v35  ;;  %v2304_v35 = vld [vmem:[%s5787_s12] sm:$0x1] }
 0x518   : > { %4080 = vmatprep.subr.bf16.mxu0 %v4594_v12  ;;  %v4649_v12 = vld [vmem:[%s5788_s13] sm:$0xff]  }
 0x51a   : > { %4059 = vmatpush3.bf16.msra.mxu1 %v4595_v13  ;;  %v4650_v13 = vld [vmem:[%s5788_s13 + $0x8] sm:$0xff]  }
 0x51b   : > { %4081 = vmatpush3.bf16.msra.mxu0 %v4596_v14  ;;  %4060 = vmatprep.subr.bf16.mxu1 %v4597_v15 }
 0x51c   : > { %4082 = vmatprep.subr.bf16.mxu0 %v4598_v16 }
 0x51e   : > { %4061 = vmatpush3.bf16.msra.mxu1 %v4599_v17 }
 0x51f   : > { %4083 = vmatpush3.bf16.msra.mxu0 %v4600_v18  ;;  %4062 = vmatprep.subr.bf16.mxu1 %v4601_v19 }
 0x520   : > { %4084 = vmatprep.subr.bf16.mxu0 %v4602_v20 }
 0x522   : > { %4063 = vmatpush3.bf16.msra.mxu1 %v4603_v21 }
 0x523   : > { %4085 = vmatpush3.bf16.msra.mxu0 %v4604_v22  ;;  %4064 = vmatprep.subr.bf16.mxu1 %v4605_v23 }
 0x524   : > { %4086 = vmatprep.subr.bf16.mxu0 %v4606_v27 }
 0x526   : > { %4065 = vmatpush3.bf16.msra.mxu1 %v4607_v28 }
 0x527   : > { %4087 = vmatpush3.bf16.msra.mxu0 %v4608_v29  ;;  %4066 = vmatprep.subr.bf16.mxu1 %v4609_v30 }
 0x528   : > { %4088 = vmatprep.subr.bf16.mxu0 %v4610_v32 }
 0x52a   : > { %4067 = vmatpush3.bf16.msra.mxu1 %v4611_v33 }
 0x52b   : > { %4089 = vmatpush3.bf16.msra.mxu0 %v4612_v36  ;;  %4068 = vmatprep.subr.bf16.mxu1 %v4613_v37 }
 0x52c   : > { %4090 = vmatprep.subr.bf16.mxu0 %v4614_v38 }
 0x52e   : > { %4069 = vmatpush3.bf16.msra.mxu1 %v4615_v39 }
 0x52f   : > { %4091 = vmatpush3.bf16.msra.mxu0 %v4616_v40  ;;  %4098 = vmatprep.subr.bf16.mxu1 %v4617_v41 }
 0x530   : > { %4120 = vmatprep.subr.bf16.mxu0 %v4618_v42 }
 0x531   : > { %3266 = vmatmul.mubr.bf16.vlgmr.msra.gmra.mrb[36].mxu1 %v2040_v44 }
 0x532   : > { %3306 = vmatmul.mubr.bf16.vlgmr.msra.gmra.mrb[40].mxu0 %v2042_v46  ;;  %4099 = vmatpush3.bf16.msra.mxu1 %v4619_v43 }
 0x533   : > { %3345 = vmatprep.mubr.bf16.mxu1 %v2045_v48  ;;  %4121 = vmatpush3.bf16.msra.mxu0 %v4620_v45 }
 0x534   : > { %3385 = vmatprep.mubr.bf16.mxu0 %v2047_v49  ;;  %4100 = vmatprep.subr.bf16.mxu1 %v4621_v47 }
 0x535   : > { %4122 = vmatprep.subr.bf16.mxu0 %v4622_v24 }
 0x536   : > { %4101 = vmatpush3.bf16.msra.mxu1 %v4623_v25 }
 0x537   : > { %4123 = vmatpush3.bf16.msra.mxu0 %v4624_v50  ;;  %4102 = vmatprep.subr.bf16.mxu1 %v4625_v26 }
 0x538   : > { %4124 = vmatprep.subr.bf16.mxu0 %v4626_v31 }
 0x53a   : > { %4103 = vmatpush3.bf16.msra.mxu1 %v4627_v51 }
 0x53b   : > { %4125 = vmatpush3.bf16.msra.mxu0 %v4628_v52  ;;  %4104 = vmatprep.subr.bf16.mxu1 %v4629_v61 }
 0x53c   : > { %4126 = vmatprep.subr.bf16.mxu0 %v4630_v54 }
 0x53e   : > { %4105 = vmatpush3.bf16.msra.mxu1 %v4631_v55 }
 0x53f   : > { %4127 = vmatpush3.bf16.msra.mxu0 %v4632_v56  ;;  %4106 = vmatprep.subr.bf16.mxu1 %v4633_v57 }
 0x540   : > { %4128 = vmatprep.subr.bf16.mxu0 %v4634_v59 }
 0x542   : > { %4107 = vmatpush3.bf16.msra.mxu1 %v4635_v60 }
 0x543   : > { %4129 = vmatpush3.bf16.msra.mxu0 %v4636_v62  ;;  %4108 = vmatprep.subr.bf16.mxu1 %v4637_v0 }
 0x544   : > { %4130 = vmatprep.subr.bf16.mxu0 %v4638_v2 }
 0x546   : > { %4109 = vmatpush3.bf16.msra.mxu1 %v4639_v3 }
 0x547   : > { %4131 = vmatpush3.bf16.msra.mxu0 %v4640_v4  ;;  %4110 = vmatprep.subr.bf16.mxu1 %v4641_v5  ;;  %v3399_v4 = vld [vmem:[%s5789_s14] sm:$0x1] }
 0x548   : > { %4132 = vmatprep.subr.bf16.mxu0 %v4642_v6 }
 0x54a   : > { %4111 = vmatpush3.bf16.msra.mxu1 %v4643_v7 }
 0x54b   : > { %4133 = vmatpush3.bf16.msra.mxu0 %v4644_v8  ;;  %4112 = vmatprep.subr.bf16.mxu1 %v4645_v53 }
 0x54c   : > { %4134 = vmatprep.subr.bf16.mxu0 %v4646_v58 }
 0x54e   : > { %4113 = vmatpush3.bf16.msra.mxu1 %v4647_v63 }
 0x54f   : > { %4135 = vmatpush3.bf16.msra.mxu0 %v4648_v9  ;;  %4383 = vmatprep.subr.bf16.mxu1 %v4715_v1 }
 0x551   : > { %3346 = vmatmul.mubr.bf16.vlgmr.msra.gmra.mrb[40].mxu1 %v2044_v10 }
 0x552   : > { %3386 = vmatmul.mubr.bf16.vlgmr.msra.gmra.mrb[44].mxu0 %v2046_v11  ;;  %4387 = vmatprep.mubr.msk.bf16.mxu1 %vm4716_vm0, %v4715_v1 }
 0x553   : > { %4384 = vmatpush3.bf16.msra.mxu1 %v4649_v12 }
 0x554   : > { %4385 = vmatprep.subr.bf16.mxu1 %v4715_v1 }
 0x557   : > { %4386 = vmatpush3.bf16.msra.mxu1 %v4650_v13 }
 0x5c4   : > { %v3982_v34 = vpop.f32.mrb[28].mxu1  ;;  %v4004_v14 = vpop.f32.mrb[32].mxu0 }
 0x5c5   : > { %v3983_v15 = vpop.f32.mrb[29].mxu1  ;;  %v4005_v16 = vpop.f32.mrb[33].mxu0 }
 0x5c6   : > { %v3984_v17 = vadd.f32 %v3983_v15, %v3982_v34  ;;  %v4006_v18 = vadd.f32 %v4005_v16, %v4004_v14  ;;  %v3985_v19 = vpop.f32.mrb[30].mxu1  ;;  %v4007_v20 = vpop.f32.mrb[34].mxu0 }
 0x5c7   : > { %v3986_v21 = vpop.f32.mrb[31].mxu1  ;;  %v4008_v22 = vpop.f32.mrb[35].mxu0 }
 0x5c8   : > { %v3108_v23 = vadd.f32 %v3984_v17, %v2304_v35 }
 0x5ca   : > { %v3148_v27 = vadd.f32 %v4006_v18, %v3108_v23 }
 0x5e4   : > { %v4026_v28 = vpop.f32.mrb[32].mxu1  ;;  %v4048_v29 = vpop.f32.mrb[36].mxu0 }
 0x5e5   : > { %v4027_v1 = vpop.f32.mrb[33].mxu1  ;;  %v4049_v30 = vpop.f32.mrb[37].mxu0 }
 0x5e6   : > { %v4028_v32 = vadd.f32 %v4027_v1, %v4026_v28  ;;  %v4050_v33 = vadd.f32 %v4049_v30, %v4048_v29  ;;  %v4029_v36 = vpop.f32.mrb[34].mxu1  ;;  %v4051_v37 = vpop.f32.mrb[38].mxu0 }
 0x5e7   : > { %v4030_v38 = vpop.f32.mrb[35].mxu1  ;;  %v4052_v39 = vpop.f32.mrb[39].mxu0 }
 0x5e8   : > { %v3188_v40 = vadd.f32 %v4028_v32, %v3148_v27 }
 0x5ea   : > { %v3228_v41 = vadd.f32 %v4050_v33, %v3188_v40 }
 0x604   : > { %v4070_v42 = vpop.f32.mrb[36].mxu1 }
 0x605   : > { %v4092_v43 = vpop.f32.mrb[40].mxu0  ;;  %v4071_v44 = vpop.f32.mrb[37].mxu1 }
 0x606   : > { %v4072_v45 = vadd.f32 %v4071_v44, %v4070_v42  ;;  %v4093_v46 = vpop.f32.mrb[41].mxu0  ;;  %v4073_v47 = vpop.f32.mrb[38].mxu1 }
 0x607   : > { %v4094_v48 = vadd.f32 %v4093_v46, %v4092_v43  ;;  %v4095_v24 = vpop.f32.mrb[42].mxu0  ;;  %v4074_v49 = vpop.f32.mrb[39].mxu1 }
 0x608   : > { %v3268_v25 = vadd.f32 %v4072_v45, %v3228_v41  ;;  %v4096_v50 = vpop.f32.mrb[43].mxu0 }
 0x60a   : > { %v3308_v26 = vadd.f32 %v4094_v48, %v3268_v25 }
 0x624   : > { %v4114_v31 = vpop.f32.mrb[40].mxu1 }
 0x625   : > { %v4136_v51 = vpop.f32.mrb[44].mxu0  ;;  %v4115_v52 = vpop.f32.mrb[41].mxu1 }
 0x626   : > { %v4116_v61 = vadd.f32 %v4115_v52, %v4114_v31  ;;  %v4137_v54 = vpop.f32.mrb[45].mxu0  ;;  %v4117_v55 = vpop.f32.mrb[42].mxu1 }
 0x627   : > { %v4138_v56 = vadd.f32 %v4137_v54, %v4136_v51  ;;  %v4139_v57 = vpop.f32.mrb[46].mxu0  ;;  %v4118_v59 = vpop.f32.mrb[43].mxu1 }
 0x628   : > { %v3348_v60 = vadd.f32 %v4116_v61, %v3308_v26  ;;  %v4140_v62 = vpop.f32.mrb[47].mxu0 }
 0x62a   : > { %v3388_v0 = vadd.f32 %v4138_v56, %v3348_v60 }
 0x62c   : > { %v3393_v2 = vmax.f32 %v3388_v0, 0.0 }
 0x62e   : > { %v3394_v3 = vpack.c.bf16 %v3393_v2, %v3393_v2 }
 0x630   : > { %4388 = vmatmul.mubr.msk.bf16.vlgmr.msra.gmra.mrb[44].mxu1 %vm3412_vm5, %v3394_v3 }
 0x703   : > { %v3450_v5 = vpop.f32.mrb[44].mxu1 }
 0x704   : > { %v3451_v6 = vadd.f32 %v3450_v5, %v3399_v4  ;;  %v4389_v7 = vpop.f32.mrb[45].mxu1 }
 0x705   : > { %v3453_v8 = vpop.f32.mrb[46].mxu1 }
 0x706   : > { %v4390_v53 = vpop.f32.mrb[47].mxu1  ;;  %3457 = vst.msk [vmem:[%s486_s0] sm:$0x1] %vm3456_vm6, %v3451_v6 }
 0x707   : > { %4664 = shalt.err (!%p4661_p3)
}
 0x708   : > { %s4665_s30 = scalar_lea.hbm %s5733_s26, 16  ;;  %s4669_s0 = scalar_lea.hbm %s5790_s15, 32 }
 0x709   : > { %p4666_p4 = scmp.ne.s32.totalorder %s5733_s26, %s4665_s30  ;;  %p4670_p9 = scmp.lt.u32.totalorder %s5733_s26, %s5790_s15 }
 0x70a   : > { %p4671_p10 = scmp.lt.u32.totalorder %s4669_s0, %s4665_s30  ;;  %p4673_p12 = scmp.lt.u32.totalorder %s4665_s30, %s5733_s26 }
 0x70b   : > { %p4667_p7 = pnand %p4666_p4, %p4836_p5 }
 0x70c   : > { %p4672_p11 = por %p4671_p10, %p4670_p9 }
 0x70d   : > { %p4668_p8 = pneg %p4667_p7 }
 0x70e   : > { %p4674_p13 = por %p4673_p12, %p4672_p11 }
 0x710   : > { %p4675_p0 = pnand %p4674_p13, %p4668_p8 }
 0x712   : > { %4678 = shalt.err (!%p4675_p0)
}
 0x713   : > { %4391 = dma.vmem_to_hbm [thread:$0]  (%p4836_p5), %s5735_s1, 16, %s5733_s26, %s3459_s22  }
 0x714 PF: > { %p4397_p1 = scmp.ge.s32.totalorder %s4713_s21, 2  ;;  %s3483_s23 = sand.u32 1, %s4701_s18  }
 0x715   : > { %s3484_s17 = scalar_lea.sflag [#allocation7], %s3483_s23 }
 0x716   : > { %p4394_p2 = pnand %p4397_p1, %p4840_p6 }
 0x718   : > { %4696 = dma.done.wait (!%p4394_p2), %s3484_s17, 16  }
 0x719   : > { %4698 = vsyncadd (!%p4394_p2), %s3484_s17, 4294967280  ;;  %s5804_s25 = sld [smem:[#allocation9_spill]]  ;;  %s5805_s20 = sld [smem:[#allocation10_spill]] }
 0x71a   : > { %p25_p3 = scmp.ge.s32.totalorder %s4823_s24, 4   ;;  %s5806_s18 = smov %s4705_s19 }
 0x71b   : > { %s5808_s21 = smov %s4823_s24 }
 0x71c   :  { %27 = sbr.rel (!%p25_p3) target bundleno = 8 (0x8), region = 125 }
 0x71f   : > { %s5807_s19 = smov %s5804_s25 }
 0x723   :  { %3488 = vsyncpa [#allocation7], 1 }
 0x724   :  { %3490 = vsyncpa [#allocation7 + $0x1], 1 }

</bundles_post_ra>
